<compile_context>
chip_gen: v6e
topology: v6e:2x2x1
jax: 0.10.0
libtpu: 0.0.40
codegen_flags: <defaults>
</compile_context>

<pallas_src>
import math

import numpy as np
import jax
import jax.numpy as jnp
from jax import lax
from jax.experimental import pallas as pl
from jax.experimental.pallas import tpu as pltpu

# ----------------------------------------------------------------------------
# Small synthetic T5-encoder config (mirrors the shapes implied by t5.py)
# ----------------------------------------------------------------------------
VOCAB = 64
NUM_LAYERS = 2
MAX_SEQ_LEN = 8          # == T in the example below
EMBED_DIM = 32           # D
NUM_HEADS = 4            # H
HEAD_DIM = 8             # Dh ;  H * Dh == D
FF_DIM = 64
NUM_BUCKETS = 8
MAX_DISTANCE = 16
EPS = 1e-6               # RMSNorm epsilon
NEG = -1e9               # additive mask value


# ----------------------------------------------------------------------------
# Fused Pallas kernel: all encoder layers + final norm, all batches in 1 step
# ----------------------------------------------------------------------------
def _rms_norm(x, w):
  # T5 layer-norm: no mean subtraction, rsqrt of mean-square, scale by weight.
  var = jnp.mean(x * x, axis=-1, keepdims=True)
  return x * lax.rsqrt(var + EPS) * w


def t5_encoder_kernel(x_ref, sa_ref, et_ref, vm_ref, seg_ref,
                      an_ref, wqkv_ref, wo_ref, fn_ref, w1_ref, w2_ref,
                      final_ref, out_ref):
  """Full T5 encoder stack; activations are a (B*T, D) slab resident in VMEM."""
  x = x_ref[...]            # (N, D)     N = B*T
  sa = sa_ref[...]          # (N, GT)    GT = B*H*T ; rel-bias + pad + block mask
  et = et_ref[...]          # (GT, N)    0/1 expansion matrix
  vm = vm_ref[...]          # (GT, D)    0/1 head-selection mask
  seg = seg_ref[...]        # (GT, GT)   0/1 block-diagonal (segment) ones
  D = EMBED_DIM

  # TODO(synk): switch to lax.fori_loop + pl.ds weight slices if NUM_LAYERS
  # is ever scaled up (static unroll is fine at L=2).
  for l in range(NUM_LAYERS):
    # ---- self-attention sub-layer (pre-RMSNorm; T5: no 1/sqrt(d) scaling) ----
    xn = _rms_norm(x, an_ref[l])                                        # (N, D)
    qkv = jnp.dot(xn, wqkv_ref[l], preferred_element_type=jnp.float32)  # (N, 3D)
    q = qkv[:, :D]
    k = qkv[:, D:2 * D]
    v = qkv[:, 2 * D:]

    # Block-diagonal (batch, head) expansion of keys / values:
    #   k_exp[(b*H+h)*T+s, h'*Dh+dh] = k[b*T+s, h'*Dh+dh] * [h == h']
    k_exp = jnp.dot(et, k, preferred_element_type=jnp.float32) * vm     # (GT, D)
    v_exp = jnp.dot(et, v, preferred_element_type=jnp.float32) * vm     # (GT, D)

    # Scores: one q @ k_exp^T matmul; sa adds rel-pos bias, key pad mask and
    # the -1e9 cross-batch block mask.
    s = lax.dot_general(q, k_exp, (((1,), (1,)), ((), ())),
                        preferred_element_type=jnp.float32) + sa        # (N, GT)
    s = s - jnp.max(s, axis=-1, keepdims=True)
    p = jnp.exp(s)                      # masked / cross-batch entries -> exactly 0
    # Per-(batch, head) softmax denominator, broadcast back via one matmul.
    denom = jnp.dot(p, seg, preferred_element_type=jnp.float32)         # (N, GT)
    p = p / jnp.where(denom > 0.0, denom, 1.0)                          # exact divide

    o = jnp.dot(p, v_exp, preferred_element_type=jnp.float32)           # (N, D)
    x = x + jnp.dot(o, wo_ref[l], preferred_element_type=jnp.float32)   # residual

    # ---- feed-forward sub-layer (pre-RMSNorm, sequential ReLU FF) ----
    xn2 = _rms_norm(x, fn_ref[l])
    h1 = jnp.maximum(
        jnp.dot(xn2, w1_ref[l], preferred_element_type=jnp.float32), 0.0)
    x = x + jnp.dot(h1, w2_ref[l], preferred_element_type=jnp.float32)

  # Output stays in its natural (B*T, D) layout; a lane-dense (B, T*D)
  # presentation would need an in-kernel relayout that costs more than the
  # 2 KiB store it saves at this size.
  out_ref[...] = _rms_norm(x, final_ref[...])


# ----------------------------------------------------------------------------
# Pallas wrapper: single grid step, everything resident in VMEM
# ----------------------------------------------------------------------------
def t5_encoder_pallas(x2d, score_add, et, vm, seg, stacked, final_norm_w):
  N, D = x2d.shape
  GT = et.shape[0]
  L = NUM_LAYERS

  def full(shape):
    return pl.BlockSpec(shape, lambda i: (0,) * len(shape))

  return pl.pallas_call(
      t5_encoder_kernel,
      out_shape=jax.ShapeDtypeStruct((N, D), jnp.float32),
      grid=(1,),
      in_specs=[
          full((N, D)),             # x
          full((N, GT)),            # score_add
          full((GT, N)),            # ET expansion
          full((GT, D)),            # VM head mask
          full((GT, GT)),           # SEG block-diag ones
          full((L, D)),             # attn RMSNorm w
          full((L, D, 3 * D)),      # Wqkv
          full((L, D, D)),          # Wo
          full((L, D)),             # ffn RMSNorm w
          full((L, D, FF_DIM)),     # W1
          full((L, FF_DIM, D)),     # W2
          full((1, D)),             # final RMSNorm w
      ],
      out_specs=full((N, D)),
      compiler_params=pltpu.CompilerParams(
          dimension_semantics=("arbitrary",)),
  )(x2d, score_add, et, vm, seg, stacked["attn_norm"], stacked["wqkv"],
    stacked["wo"], stacked["ffn_norm"], stacked["w1"], stacked["w2"],
    final_norm_w)


# ----------------------------------------------------------------------------
# Glue: relative-position buckets (attn_utils.build_relative_position_buckets)
# ----------------------------------------------------------------------------
def build_relative_position_buckets(query_length, key_length, num_buckets,
                                    max_distance):
  context_position = jnp.arange(query_length, dtype=jnp.int32)[:, None]
  memory_position = jnp.arange(key_length, dtype=jnp.int32)[None, :]
  relative_position = memory_position - context_position       # (q, k)
  # bidirectional=True
  num_buckets //= 2
  relative_buckets = (relative_position > 0).astype(jnp.int32) * num_buckets
  relative_position = jnp.abs(relative_position)
  max_exact = num_buckets // 2
  is_small = relative_position < max_exact
  rel_if_large = max_exact + (
      jnp.log(relative_position.astype(jnp.float32) / max_exact + 1e-20)
      / math.log(max_distance / max_exact)
      * (num_buckets - max_exact)).astype(jnp.int32)
  rel_if_large = jnp.minimum(rel_if_large, num_buckets - 1)
  relative_buckets = relative_buckets + jnp.where(
      is_small, relative_position, rel_if_large)
  return relative_buckets                                       # (q, k) int32


# ----------------------------------------------------------------------------
# Parameters (deterministic, synthetic)
# ----------------------------------------------------------------------------
def init_params(key):
  params = {"layers": []}
  k_emb, k_rel, key = jax.random.split(key, 3)
  params["tok_emb"] = 0.05 * jax.random.normal(
      k_emb, (VOCAB, EMBED_DIM), jnp.float32)
  params["rel_bias"] = 0.05 * jax.random.normal(
      k_rel, (NUM_BUCKETS, NUM_HEADS), jnp.float32)
  for _ in range(NUM_LAYERS):
    keys = jax.random.split(key, 7)
    key = keys[-1]
    params["layers"].append({
        "attn_norm": jnp.ones((EMBED_DIM,), jnp.float32),
        "wq": 0.05 * jax.random.normal(keys[0], (EMBED_DIM, EMBED_DIM)),
        "wk": 0.05 * jax.random.normal(keys[1], (EMBED_DIM, EMBED_DIM)),
        "wv": 0.05 * jax.random.normal(keys[2], (EMBED_DIM, EMBED_DIM)),
        "wo": 0.05 * jax.random.normal(keys[3], (EMBED_DIM, EMBED_DIM)),
        "ffn_norm": jnp.ones((EMBED_DIM,), jnp.float32),
        "w1": 0.05 * jax.random.normal(keys[4], (EMBED_DIM, FF_DIM)),
        "w2": 0.05 * jax.random.normal(keys[5], (FF_DIM, EMBED_DIM)),
    })
  params["final_norm"] = jnp.ones((1, EMBED_DIM), jnp.float32)
  return params


def prepare_stacked_params(params):
  """Stack per-layer weights into lane-dense layouts (init time only)."""
  def stack(name):
    return jnp.stack([lp[name] for lp in params["layers"]], axis=0)
  wqkv = jnp.concatenate(
      [stack("wq"), stack("wk"), stack("wv")], axis=-1)         # (L, D, 3D)
  return {
      "attn_norm": stack("attn_norm"),                          # (L, D)
      "wqkv": wqkv,
      "wo": stack("wo"),                                        # (L, D, D)
      "ffn_norm": stack("ffn_norm"),                            # (L, D)
      "w1": stack("w1"),                                        # (L, D, FF)
      "w2": stack("w2"),                                        # (L, FF, D)
  }


def build_constants(B, T, H, Dh):
  """0/1 structural masks for the block-diagonal attention (init time)."""
  D = H * Dh
  GT = B * H * T
  N = B * T
  et = np.zeros((GT, N), np.float32)        # ET[(b*H+h)*T+s, b*T+s] = 1
  vm = np.zeros((GT, D), np.float32)        # VM[(b*H+h)*T+s, h*Dh:(h+1)*Dh] = 1
  for b in range(B):
    for h in range(H):
      for s in range(T):
        r = (b * H + h) * T + s
        et[r, b * T + s] = 1.0
        vm[r, h * Dh:(h + 1) * Dh] = 1.0
  seg_id = np.arange(GT) // T
  seg = (seg_id[:, None] == seg_id[None, :]).astype(np.float32)  # (GT, GT)
  bb = np.where(np.eye(B, dtype=bool), 0.0, NEG).astype(np.float32)  # (B, B)
  return jnp.asarray(et), jnp.asarray(vm), jnp.asarray(seg), jnp.asarray(bb)


# ----------------------------------------------------------------------------
# T5Encoder.forward (init-time prep + jitted forward)
# ----------------------------------------------------------------------------
def make_t5_encoder(params, batch_size, seq_len):
  B, T = batch_size, seq_len
  assert MAX_SEQ_LEN >= T
  H = NUM_HEADS
  stacked = prepare_stacked_params(params)
  et, vm, seg, bb = build_constants(B, T, H, HEAD_DIM)
  buckets_full = build_relative_position_buckets(
      MAX_SEQ_LEN, MAX_SEQ_LEN, NUM_BUCKETS, MAX_DISTANCE)
  tok_emb = params["tok_emb"]
  rel_bias = params["rel_bias"]
  final_w = params["final_norm"]

  @jax.jit
  def forward(input_ids, input_pos, pad_mask):
    # Token embedding gather stays as plain-JAX glue.
    # TODO(synk): a DMA-gather Pallas embedding kernel is not worthwhile at
    # this vocabulary / batch size.
    x = jnp.take(tok_emb, input_ids, axis=0).reshape(B * T, EMBED_DIM)

    # Layer-0 relative-position bias (reused by all layers).
    buckets = buckets_full[input_pos, :MAX_SEQ_LEN]              # (T, T)
    pos_bias = jnp.take(rel_bias, buckets, axis=0)               # (T, T, H)
    pos_bias = jnp.transpose(pos_bias, (2, 0, 1))                # (H, T, T)

    # enc_attn_mask_cache is all zeros, so the attention mask is just the
    # additive key pad mask broadcast over queries.
    key_mask = pad_mask[:, 0, 0, :]                              # (B, T)

    # Additive score term for the block-diagonal layout:
    #   sa[b*T+t, (b'*H+h)*T+s] = pos_bias[h,t,s] + pad[b',s] + (NEG if b!=b')
    pb = jnp.transpose(pos_bias, (1, 0, 2))                      # (T, H, T)
    sa = (pb[None, :, None, :, :]
          + key_mask[None, None, :, None, :]
          + bb[:, None, :, None, None])                          # (B,T,B,H,T)
    sa = sa.reshape(B * T, B * H * T)

    out = t5_encoder_pallas(x, sa, et, vm, seg, stacked, final_w)
    return out.reshape(B, T, EMBED_DIM)

  return forward


# ----------------------------------------------------------------------------
# Pure-JAX reference (mirrors the PyTorch module) for a correctness check
# ----------------------------------------------------------------------------
def t5_encoder_reference(params, input_ids, input_pos, pad_mask):
  B, T = input_ids.shape
  enc_mask = jnp.zeros((MAX_SEQ_LEN, MAX_SEQ_LEN),
                       jnp.float32)[input_pos, :MAX_SEQ_LEN]
  enc_mask = enc_mask[None, None] + pad_mask                     # (B,1,T,T)
  buckets = build_relative_position_buckets(
      MAX_SEQ_LEN, MAX_SEQ_LEN, NUM_BUCKETS, MAX_DISTANCE)
  buckets = buckets[input_pos, :MAX_SEQ_LEN]
  pos_bias = jnp.transpose(
      jnp.take(params["rel_bias"], buckets, axis=0), (2, 0, 1))  # (H,T,T)
  x = jnp.take(params["tok_emb"], input_ids, axis=0)

  def rms(x, w):
    return x * lax.rsqrt(jnp.mean(x * x, -1, keepdims=True) + EPS) * w

  def split_heads(a):
    return jnp.transpose(a.reshape(B, T, NUM_HEADS, HEAD_DIM), (0, 2, 1, 3))

  for lp in params["layers"]:
    xn = rms(x, lp["attn_norm"])
    q, k, v = xn @ lp["wq"], xn @ lp["wk"], xn @ lp["wv"]
    qh, kh, vh = split_heads(q), split_heads(k), split_heads(v)
    s = jnp.einsum("bhtd,bhsd->bhts", qh, kh) + enc_mask + pos_bias[None]
    p = jax.nn.softmax(s, axis=-1)
    o = jnp.einsum("bhts,bhsd->bhtd", p, vh)
    o = jnp.transpose(o, (0, 2, 1, 3)).reshape(B, T, EMBED_DIM)
    x = x + o @ lp["wo"]
    xn2 = rms(x, lp["ffn_norm"])
    x = x + jnp.maximum(xn2 @ lp["w1"], 0.0) @ lp["w2"]
  return rms(x, params["final_norm"])


# ----------------------------------------------------------------------------
if __name__ == "__main__":
  B, T = 2, MAX_SEQ_LEN
  key = jax.random.PRNGKey(0)
  k_ids, k_par = jax.random.split(key)
  params = init_params(k_par)

  input_ids = jax.random.randint(k_ids, (B, T), 0, VOCAB, dtype=jnp.int32)
  input_pos = jnp.arange(T, dtype=jnp.int32)
  # additive pad mask (0 = keep, large negative = padded); pad last 2 of row 1
  pad_mask = jnp.zeros((B, 1, 1, T), jnp.float32)
  pad_mask = pad_mask.at[1, :, :, T - 2:].set(NEG)

  encoder = make_t5_encoder(params, B, T)
  out = jax.block_until_ready(encoder(input_ids, input_pos, pad_mask))
  ref = t5_encoder_reference(params, input_ids, input_pos, pad_mask)

  assert out.shape == (B, T, EMBED_DIM)
  assert bool(jnp.all(jnp.isfinite(out)))
  # exact-divide softmax -> only MXU accumulation-order differences remain
  assert bool(jnp.max(jnp.abs(out - ref)) < 2e-3)
  print("KERNEL_OK")
</pallas_src>

<mosaic_0001>
module attributes {stable_mosaic.version = 11 : i64} {
  func.func @t5_encoder_kernel(%arg0: i32, %arg1: memref<16x32xf32, #tpu.memory_space<vmem>>, %arg2: memref<16x64xf32, #tpu.memory_space<vmem>>, %arg3: memref<64x16xf32, #tpu.memory_space<vmem>>, %arg4: memref<64x32xf32, #tpu.memory_space<vmem>>, %arg5: memref<64x64xf32, #tpu.memory_space<vmem>>, %arg6: memref<2x32xf32, #tpu.memory_space<vmem>>, %arg7: memref<2x32x96xf32, #tpu.memory_space<vmem>>, %arg8: memref<2x32x32xf32, #tpu.memory_space<vmem>>, %arg9: memref<2x32xf32, #tpu.memory_space<vmem>>, %arg10: memref<2x32x64xf32, #tpu.memory_space<vmem>>, %arg11: memref<2x64x32xf32, #tpu.memory_space<vmem>>, %arg12: memref<1x32xf32, #tpu.memory_space<vmem>>, %arg13: memref<16x32xf32, #tpu.memory_space<vmem>>) attributes {dimension_semantics = [#tpu.dimension_semantics<arbitrary>], iteration_bounds = array<i64: 1>, scalar_prefetch = 0 : i64, scratch_operands = 0 : i64, tpu.core_type = #tpu.core_type<tc>, window_params = [{pipeline_mode = #tpu.pipeline_mode<synchronous>, transform_indices = @transform_0, window_bounds = array<i64: 16, 32>}, {pipeline_mode = #tpu.pipeline_mode<synchronous>, transform_indices = @transform_1, window_bounds = array<i64: 16, 64>}, {pipeline_mode = #tpu.pipeline_mode<synchronous>, transform_indices = @transform_2, window_bounds = array<i64: 64, 16>}, {pipeline_mode = #tpu.pipeline_mode<synchronous>, transform_indices = @transform_3, window_bounds = array<i64: 64, 32>}, {pipeline_mode = #tpu.pipeline_mode<synchronous>, transform_indices = @transform_4, window_bounds = array<i64: 64, 64>}, {pipeline_mode = #tpu.pipeline_mode<synchronous>, transform_indices = @transform_5, window_bounds = array<i64: 2, 32>}, {pipeline_mode = #tpu.pipeline_mode<synchronous>, transform_indices = @transform_6, window_bounds = array<i64: 2, 32, 96>}, {pipeline_mode = #tpu.pipeline_mode<synchronous>, transform_indices = @transform_7, window_bounds = array<i64: 2, 32, 32>}, {pipeline_mode = #tpu.pipeline_mode<synchronous>, transform_indices = @transform_8, window_bounds = array<i64: 2, 32>}, {pipeline_mode = #tpu.pipeline_mode<synchronous>, transform_indices = @transform_9, window_bounds = array<i64: 2, 32, 64>}, {pipeline_mode = #tpu.pipeline_mode<synchronous>, transform_indices = @transform_10, window_bounds = array<i64: 2, 64, 32>}, {pipeline_mode = #tpu.pipeline_mode<synchronous>, transform_indices = @transform_11, window_bounds = array<i64: 1, 32>}, {pipeline_mode = #tpu.pipeline_mode<synchronous>, transform_indices = @transform_12, window_bounds = array<i64: 16, 32>}]} {
    %c0 = arith.constant 0 : index
    %c0_0 = arith.constant 0 : index
    %0 = vector.load %arg1[%c0, %c0_0] : memref<16x32xf32, #tpu.memory_space<vmem>>, vector<16x32xf32>
    %c0_1 = arith.constant 0 : index
    %c0_2 = arith.constant 0 : index
    %1 = vector.load %arg2[%c0_1, %c0_2] : memref<16x64xf32, #tpu.memory_space<vmem>>, vector<16x64xf32>
    %c0_3 = arith.constant 0 : index
    %c0_4 = arith.constant 0 : index
    %2 = vector.load %arg3[%c0_3, %c0_4] : memref<64x16xf32, #tpu.memory_space<vmem>>, vector<64x16xf32>
    %c0_5 = arith.constant 0 : index
    %c0_6 = arith.constant 0 : index
    %3 = vector.load %arg4[%c0_5, %c0_6] : memref<64x32xf32, #tpu.memory_space<vmem>>, vector<64x32xf32>
    %c0_7 = arith.constant 0 : index
    %c0_8 = arith.constant 0 : index
    %4 = vector.load %arg5[%c0_7, %c0_8] : memref<64x64xf32, #tpu.memory_space<vmem>>, vector<64x64xf32>
    %c0_9 = arith.constant 0 : index
    %c0_10 = arith.constant 0 : index
    %5 = vector.load %arg6[%c0_9, %c0_10] : memref<2x32xf32, #tpu.memory_space<vmem>>, vector<1x32xf32>
    %6 = vector.shape_cast %5 : vector<1x32xf32> to vector<32xf32>
    %7 = arith.mulf %0, %0 : vector<16x32xf32>
    %cst = arith.constant dense<0.000000e+00> : vector<16xf32>
    %8 = vector.multi_reduction <add>, %7, %cst [1] : vector<16x32xf32> to vector<16xf32>
    %9 = vector.shape_cast %8 : vector<16xf32> to vector<16x1xf32>
    %cst_11 = arith.constant 3.200000e+01 : f32
    %10 = vector.broadcast %cst_11 : f32 to vector<16x1xf32>
    %11 = arith.divf %9, %10 : vector<16x1xf32>
    %cst_12 = arith.constant 9.99999997E-7 : f32
    %12 = vector.broadcast %cst_12 : f32 to vector<16x1xf32>
    %13 = arith.addf %11, %12 : vector<16x1xf32>
    %14 = math.rsqrt %13 : vector<16x1xf32>
    %15 = vector.broadcast %14 : vector<16x1xf32> to vector<16x32xf32>
    %16 = arith.mulf %0, %15 : vector<16x32xf32>
    %17 = vector.shape_cast %6 : vector<32xf32> to vector<1x32xf32>
    %18 = vector.broadcast %17 : vector<1x32xf32> to vector<16x32xf32>
    %19 = arith.mulf %16, %18 : vector<16x32xf32>
    %c0_13 = arith.constant 0 : index
    %c0_14 = arith.constant 0 : index
    %c0_15 = arith.constant 0 : index
    %20 = vector.load %arg7[%c0_13, %c0_14, %c0_15] : memref<2x32x96xf32, #tpu.memory_space<vmem>>, vector<1x32x96xf32>
    %21 = vector.shape_cast %20 : vector<1x32x96xf32> to vector<32x96xf32>
    %cst_16 = arith.constant dense<0.000000e+00> : vector<16x96xf32>
    %22 = tpu.matmul %19, %21, %cst_16 {dimension_numbers = #tpu.dot_dimension_numbers<[1], [0], [0], [1], [0, 0, 1, 1], [], []>} : vector<16x32xf32>, vector<32x96xf32>, vector<16x96xf32> -> vector<16x96xf32>
    %23 = vector.extract_strided_slice %22 {offsets = [0, 0], sizes = [16, 32], strides = [1, 1]} : vector<16x96xf32> to vector<16x32xf32>
    %24 = vector.extract_strided_slice %22 {offsets = [0, 32], sizes = [16, 32], strides = [1, 1]} : vector<16x96xf32> to vector<16x32xf32>
    %25 = vector.extract_strided_slice %22 {offsets = [0, 64], sizes = [16, 32], strides = [1, 1]} : vector<16x96xf32> to vector<16x32xf32>
    %cst_17 = arith.constant dense<0.000000e+00> : vector<64x32xf32>
    %26 = tpu.matmul %2, %24, %cst_17 {dimension_numbers = #tpu.dot_dimension_numbers<[1], [0], [0], [1], [0, 0, 1, 1], [], []>} : vector<64x16xf32>, vector<16x32xf32>, vector<64x32xf32> -> vector<64x32xf32>
    %27 = arith.mulf %26, %3 : vector<64x32xf32>
    %cst_18 = arith.constant dense<0.000000e+00> : vector<64x32xf32>
    %28 = tpu.matmul %2, %25, %cst_18 {dimension_numbers = #tpu.dot_dimension_numbers<[1], [0], [0], [1], [0, 0, 1, 1], [], []>} : vector<64x16xf32>, vector<16x32xf32>, vector<64x32xf32> -> vector<64x32xf32>
    %29 = arith.mulf %28, %3 : vector<64x32xf32>
    %cst_19 = arith.constant dense<0.000000e+00> : vector<16x64xf32>
    %30 = tpu.matmul %23, %27, %cst_19 {dimension_numbers = #tpu.dot_dimension_numbers<[1], [1], [0], [0], [0, 0, 1, 0], [], []>} : vector<16x32xf32>, vector<64x32xf32>, vector<16x64xf32> -> vector<16x64xf32>
    %31 = arith.addf %30, %1 : vector<16x64xf32>
    %cst_20 = arith.constant dense<0xFF800000> : vector<16xf32>
    %32 = vector.multi_reduction <maximumf>, %31, %cst_20 [1] : vector<16x64xf32> to vector<16xf32>
    %33 = vector.shape_cast %32 : vector<16xf32> to vector<16x1xf32>
    %34 = vector.broadcast %33 : vector<16x1xf32> to vector<16x64xf32>
    %35 = arith.subf %31, %34 : vector<16x64xf32>
    %36 = math.exp %35 : vector<16x64xf32>
    %cst_21 = arith.constant dense<0.000000e+00> : vector<16x64xf32>
    %37 = tpu.matmul %36, %4, %cst_21 {dimension_numbers = #tpu.dot_dimension_numbers<[1], [0], [0], [1], [0, 0, 1, 1], [], []>} : vector<16x64xf32>, vector<64x64xf32>, vector<16x64xf32> -> vector<16x64xf32>
    %cst_22 = arith.constant 0.000000e+00 : f32
    %38 = vector.broadcast %cst_22 : f32 to vector<16x64xf32>
    %39 = arith.cmpf ogt, %37, %38 : vector<16x64xf32>
    %cst_23 = arith.constant 1.000000e+00 : f32
    %40 = vector.broadcast %cst_23 : f32 to vector<16x64xf32>
    %41 = arith.select %39, %37, %40 : vector<16x64xi1>, vector<16x64xf32>
    %42 = arith.divf %36, %41 : vector<16x64xf32>
    %cst_24 = arith.constant dense<0.000000e+00> : vector<16x32xf32>
    %43 = tpu.matmul %42, %29, %cst_24 {dimension_numbers = #tpu.dot_dimension_numbers<[1], [0], [0], [1], [0, 0, 1, 1], [], []>} : vector<16x64xf32>, vector<64x32xf32>, vector<16x32xf32> -> vector<16x32xf32>
    %c0_25 = arith.constant 0 : index
    %c0_26 = arith.constant 0 : index
    %c0_27 = arith.constant 0 : index
    %44 = vector.load %arg8[%c0_25, %c0_26, %c0_27] : memref<2x32x32xf32, #tpu.memory_space<vmem>>, vector<1x32x32xf32>
    %45 = vector.shape_cast %44 : vector<1x32x32xf32> to vector<32x32xf32>
    %cst_28 = arith.constant dense<0.000000e+00> : vector<16x32xf32>
    %46 = tpu.matmul %43, %45, %cst_28 {dimension_numbers = #tpu.dot_dimension_numbers<[1], [0], [0], [1], [0, 0, 1, 1], [], []>} : vector<16x32xf32>, vector<32x32xf32>, vector<16x32xf32> -> vector<16x32xf32>
    %47 = arith.addf %0, %46 : vector<16x32xf32>
    %c0_29 = arith.constant 0 : index
    %c0_30 = arith.constant 0 : index
    %48 = vector.load %arg9[%c0_29, %c0_30] : memref<2x32xf32, #tpu.memory_space<vmem>>, vector<1x32xf32>
    %49 = vector.shape_cast %48 : vector<1x32xf32> to vector<32xf32>
    %50 = arith.mulf %47, %47 : vector<16x32xf32>
    %cst_31 = arith.constant dense<0.000000e+00> : vector<16xf32>
    %51 = vector.multi_reduction <add>, %50, %cst_31 [1] : vector<16x32xf32> to vector<16xf32>
    %52 = vector.shape_cast %51 : vector<16xf32> to vector<16x1xf32>
    %cst_32 = arith.constant 3.200000e+01 : f32
    %53 = vector.broadcast %cst_32 : f32 to vector<16x1xf32>
    %54 = arith.divf %52, %53 : vector<16x1xf32>
    %cst_33 = arith.constant 9.99999997E-7 : f32
    %55 = vector.broadcast %cst_33 : f32 to vector<16x1xf32>
    %56 = arith.addf %54, %55 : vector<16x1xf32>
    %57 = math.rsqrt %56 : vector<16x1xf32>
    %58 = vector.broadcast %57 : vector<16x1xf32> to vector<16x32xf32>
    %59 = arith.mulf %47, %58 : vector<16x32xf32>
    %60 = vector.shape_cast %49 : vector<32xf32> to vector<1x32xf32>
    %61 = vector.broadcast %60 : vector<1x32xf32> to vector<16x32xf32>
    %62 = arith.mulf %59, %61 : vector<16x32xf32>
    %c0_34 = arith.constant 0 : index
    %c0_35 = arith.constant 0 : index
    %c0_36 = arith.constant 0 : index
    %63 = vector.load %arg10[%c0_34, %c0_35, %c0_36] : memref<2x32x64xf32, #tpu.memory_space<vmem>>, vector<1x32x64xf32>
    %64 = vector.shape_cast %63 : vector<1x32x64xf32> to vector<32x64xf32>
    %cst_37 = arith.constant dense<0.000000e+00> : vector<16x64xf32>
    %65 = tpu.matmul %62, %64, %cst_37 {dimension_numbers = #tpu.dot_dimension_numbers<[1], [0], [0], [1], [0, 0, 1, 1], [], []>} : vector<16x32xf32>, vector<32x64xf32>, vector<16x64xf32> -> vector<16x64xf32>
    %cst_38 = arith.constant 0.000000e+00 : f32
    %66 = vector.broadcast %cst_38 : f32 to vector<16x64xf32>
    %67 = arith.maximumf %65, %66 : vector<16x64xf32>
    %c0_39 = arith.constant 0 : index
    %c0_40 = arith.constant 0 : index
    %c0_41 = arith.constant 0 : index
    %68 = vector.load %arg11[%c0_39, %c0_40, %c0_41] : memref<2x64x32xf32, #tpu.memory_space<vmem>>, vector<1x64x32xf32>
    %69 = vector.shape_cast %68 : vector<1x64x32xf32> to vector<64x32xf32>
    %cst_42 = arith.constant dense<0.000000e+00> : vector<16x32xf32>
    %70 = tpu.matmul %67, %69, %cst_42 {dimension_numbers = #tpu.dot_dimension_numbers<[1], [0], [0], [1], [0, 0, 1, 1], [], []>} : vector<16x64xf32>, vector<64x32xf32>, vector<16x32xf32> -> vector<16x32xf32>
    %71 = arith.addf %47, %70 : vector<16x32xf32>
    %c1 = arith.constant 1 : index
    %c0_43 = arith.constant 0 : index
    %72 = vector.load %arg6[%c1, %c0_43] : memref<2x32xf32, #tpu.memory_space<vmem>>, vector<1x32xf32>
    %73 = vector.shape_cast %72 : vector<1x32xf32> to vector<32xf32>
    %74 = arith.mulf %71, %71 : vector<16x32xf32>
    %cst_44 = arith.constant dense<0.000000e+00> : vector<16xf32>
    %75 = vector.multi_reduction <add>, %74, %cst_44 [1] : vector<16x32xf32> to vector<16xf32>
    %76 = vector.shape_cast %75 : vector<16xf32> to vector<16x1xf32>
    %cst_45 = arith.constant 3.200000e+01 : f32
    %77 = vector.broadcast %cst_45 : f32 to vector<16x1xf32>
    %78 = arith.divf %76, %77 : vector<16x1xf32>
    %cst_46 = arith.constant 9.99999997E-7 : f32
    %79 = vector.broadcast %cst_46 : f32 to vector<16x1xf32>
    %80 = arith.addf %78, %79 : vector<16x1xf32>
    %81 = math.rsqrt %80 : vector<16x1xf32>
    %82 = vector.broadcast %81 : vector<16x1xf32> to vector<16x32xf32>
    %83 = arith.mulf %71, %82 : vector<16x32xf32>
    %84 = vector.shape_cast %73 : vector<32xf32> to vector<1x32xf32>
    %85 = vector.broadcast %84 : vector<1x32xf32> to vector<16x32xf32>
    %86 = arith.mulf %83, %85 : vector<16x32xf32>
    %c1_47 = arith.constant 1 : index
    %c0_48 = arith.constant 0 : index
    %c0_49 = arith.constant 0 : index
    %87 = vector.load %arg7[%c1_47, %c0_48, %c0_49] : memref<2x32x96xf32, #tpu.memory_space<vmem>>, vector<1x32x96xf32>
    %88 = vector.shape_cast %87 : vector<1x32x96xf32> to vector<32x96xf32>
    %cst_50 = arith.constant dense<0.000000e+00> : vector<16x96xf32>
    %89 = tpu.matmul %86, %88, %cst_50 {dimension_numbers = #tpu.dot_dimension_numbers<[1], [0], [0], [1], [0, 0, 1, 1], [], []>} : vector<16x32xf32>, vector<32x96xf32>, vector<16x96xf32> -> vector<16x96xf32>
    %90 = vector.extract_strided_slice %89 {offsets = [0, 0], sizes = [16, 32], strides = [1, 1]} : vector<16x96xf32> to vector<16x32xf32>
    %91 = vector.extract_strided_slice %89 {offsets = [0, 32], sizes = [16, 32], strides = [1, 1]} : vector<16x96xf32> to vector<16x32xf32>
    %92 = vector.extract_strided_slice %89 {offsets = [0, 64], sizes = [16, 32], strides = [1, 1]} : vector<16x96xf32> to vector<16x32xf32>
    %cst_51 = arith.constant dense<0.000000e+00> : vector<64x32xf32>
    %93 = tpu.matmul %2, %91, %cst_51 {dimension_numbers = #tpu.dot_dimension_numbers<[1], [0], [0], [1], [0, 0, 1, 1], [], []>} : vector<64x16xf32>, vector<16x32xf32>, vector<64x32xf32> -> vector<64x32xf32>
    %94 = arith.mulf %93, %3 : vector<64x32xf32>
    %cst_52 = arith.constant dense<0.000000e+00> : vector<64x32xf32>
    %95 = tpu.matmul %2, %92, %cst_52 {dimension_numbers = #tpu.dot_dimension_numbers<[1], [0], [0], [1], [0, 0, 1, 1], [], []>} : vector<64x16xf32>, vector<16x32xf32>, vector<64x32xf32> -> vector<64x32xf32>
    %96 = arith.mulf %95, %3 : vector<64x32xf32>
    %cst_53 = arith.constant dense<0.000000e+00> : vector<16x64xf32>
    %97 = tpu.matmul %90, %94, %cst_53 {dimension_numbers = #tpu.dot_dimension_numbers<[1], [1], [0], [0], [0, 0, 1, 0], [], []>} : vector<16x32xf32>, vector<64x32xf32>, vector<16x64xf32> -> vector<16x64xf32>
    %98 = arith.addf %97, %1 : vector<16x64xf32>
    %cst_54 = arith.constant dense<0xFF800000> : vector<16xf32>
    %99 = vector.multi_reduction <maximumf>, %98, %cst_54 [1] : vector<16x64xf32> to vector<16xf32>
    %100 = vector.shape_cast %99 : vector<16xf32> to vector<16x1xf32>
    %101 = vector.broadcast %100 : vector<16x1xf32> to vector<16x64xf32>
    %102 = arith.subf %98, %101 : vector<16x64xf32>
    %103 = math.exp %102 : vector<16x64xf32>
    %cst_55 = arith.constant dense<0.000000e+00> : vector<16x64xf32>
    %104 = tpu.matmul %103, %4, %cst_55 {dimension_numbers = #tpu.dot_dimension_numbers<[1], [0], [0], [1], [0, 0, 1, 1], [], []>} : vector<16x64xf32>, vector<64x64xf32>, vector<16x64xf32> -> vector<16x64xf32>
    %cst_56 = arith.constant 0.000000e+00 : f32
    %105 = vector.broadcast %cst_56 : f32 to vector<16x64xf32>
    %106 = arith.cmpf ogt, %104, %105 : vector<16x64xf32>
    %cst_57 = arith.constant 1.000000e+00 : f32
    %107 = vector.broadcast %cst_57 : f32 to vector<16x64xf32>
    %108 = arith.select %106, %104, %107 : vector<16x64xi1>, vector<16x64xf32>
    %109 = arith.divf %103, %108 : vector<16x64xf32>
    %cst_58 = arith.constant dense<0.000000e+00> : vector<16x32xf32>
    %110 = tpu.matmul %109, %96, %cst_58 {dimension_numbers = #tpu.dot_dimension_numbers<[1], [0], [0], [1], [0, 0, 1, 1], [], []>} : vector<16x64xf32>, vector<64x32xf32>, vector<16x32xf32> -> vector<16x32xf32>
    %c1_59 = arith.constant 1 : index
    %c0_60 = arith.constant 0 : index
    %c0_61 = arith.constant 0 : index
    %111 = vector.load %arg8[%c1_59, %c0_60, %c0_61] : memref<2x32x32xf32, #tpu.memory_space<vmem>>, vector<1x32x32xf32>
    %112 = vector.shape_cast %111 : vector<1x32x32xf32> to vector<32x32xf32>
    %cst_62 = arith.constant dense<0.000000e+00> : vector<16x32xf32>
    %113 = tpu.matmul %110, %112, %cst_62 {dimension_numbers = #tpu.dot_dimension_numbers<[1], [0], [0], [1], [0, 0, 1, 1], [], []>} : vector<16x32xf32>, vector<32x32xf32>, vector<16x32xf32> -> vector<16x32xf32>
    %114 = arith.addf %71, %113 : vector<16x32xf32>
    %c1_63 = arith.constant 1 : index
    %c0_64 = arith.constant 0 : index
    %115 = vector.load %arg9[%c1_63, %c0_64] : memref<2x32xf32, #tpu.memory_space<vmem>>, vector<1x32xf32>
    %116 = vector.shape_cast %115 : vector<1x32xf32> to vector<32xf32>
    %117 = arith.mulf %114, %114 : vector<16x32xf32>
    %cst_65 = arith.constant dense<0.000000e+00> : vector<16xf32>
    %118 = vector.multi_reduction <add>, %117, %cst_65 [1] : vector<16x32xf32> to vector<16xf32>
    %119 = vector.shape_cast %118 : vector<16xf32> to vector<16x1xf32>
    %cst_66 = arith.constant 3.200000e+01 : f32
    %120 = vector.broadcast %cst_66 : f32 to vector<16x1xf32>
    %121 = arith.divf %119, %120 : vector<16x1xf32>
    %cst_67 = arith.constant 9.99999997E-7 : f32
    %122 = vector.broadcast %cst_67 : f32 to vector<16x1xf32>
    %123 = arith.addf %121, %122 : vector<16x1xf32>
    %124 = math.rsqrt %123 : vector<16x1xf32>
    %125 = vector.broadcast %124 : vector<16x1xf32> to vector<16x32xf32>
    %126 = arith.mulf %114, %125 : vector<16x32xf32>
    %127 = vector.shape_cast %116 : vector<32xf32> to vector<1x32xf32>
    %128 = vector.broadcast %127 : vector<1x32xf32> to vector<16x32xf32>
    %129 = arith.mulf %126, %128 : vector<16x32xf32>
    %c1_68 = arith.constant 1 : index
    %c0_69 = arith.constant 0 : index
    %c0_70 = arith.constant 0 : index
    %130 = vector.load %arg10[%c1_68, %c0_69, %c0_70] : memref<2x32x64xf32, #tpu.memory_space<vmem>>, vector<1x32x64xf32>
    %131 = vector.shape_cast %130 : vector<1x32x64xf32> to vector<32x64xf32>
    %cst_71 = arith.constant dense<0.000000e+00> : vector<16x64xf32>
    %132 = tpu.matmul %129, %131, %cst_71 {dimension_numbers = #tpu.dot_dimension_numbers<[1], [0], [0], [1], [0, 0, 1, 1], [], []>} : vector<16x32xf32>, vector<32x64xf32>, vector<16x64xf32> -> vector<16x64xf32>
    %cst_72 = arith.constant 0.000000e+00 : f32
    %133 = vector.broadcast %cst_72 : f32 to vector<16x64xf32>
    %134 = arith.maximumf %132, %133 : vector<16x64xf32>
    %c1_73 = arith.constant 1 : index
    %c0_74 = arith.constant 0 : index
    %c0_75 = arith.constant 0 : index
    %135 = vector.load %arg11[%c1_73, %c0_74, %c0_75] : memref<2x64x32xf32, #tpu.memory_space<vmem>>, vector<1x64x32xf32>
    %136 = vector.shape_cast %135 : vector<1x64x32xf32> to vector<64x32xf32>
    %cst_76 = arith.constant dense<0.000000e+00> : vector<16x32xf32>
    %137 = tpu.matmul %134, %136, %cst_76 {dimension_numbers = #tpu.dot_dimension_numbers<[1], [0], [0], [1], [0, 0, 1, 1], [], []>} : vector<16x64xf32>, vector<64x32xf32>, vector<16x32xf32> -> vector<16x32xf32>
    %138 = arith.addf %114, %137 : vector<16x32xf32>
    %c0_77 = arith.constant 0 : index
    %c0_78 = arith.constant 0 : index
    %139 = vector.load %arg12[%c0_77, %c0_78] : memref<1x32xf32, #tpu.memory_space<vmem>>, vector<1x32xf32>
    %140 = arith.mulf %138, %138 : vector<16x32xf32>
    %cst_79 = arith.constant dense<0.000000e+00> : vector<16xf32>
    %141 = vector.multi_reduction <add>, %140, %cst_79 [1] : vector<16x32xf32> to vector<16xf32>
    %142 = vector.shape_cast %141 : vector<16xf32> to vector<16x1xf32>
    %cst_80 = arith.constant 3.200000e+01 : f32
    %143 = vector.broadcast %cst_80 : f32 to vector<16x1xf32>
    %144 = arith.divf %142, %143 : vector<16x1xf32>
    %cst_81 = arith.constant 9.99999997E-7 : f32
    %145 = vector.broadcast %cst_81 : f32 to vector<16x1xf32>
    %146 = arith.addf %144, %145 : vector<16x1xf32>
    %147 = math.rsqrt %146 : vector<16x1xf32>
    %148 = vector.broadcast %147 : vector<16x1xf32> to vector<16x32xf32>
    %149 = arith.mulf %138, %148 : vector<16x32xf32>
    %150 = vector.broadcast %139 : vector<1x32xf32> to vector<16x32xf32>
    %151 = arith.mulf %149, %150 : vector<16x32xf32>
    %c0_82 = arith.constant 0 : index
    %c0_83 = arith.constant 0 : index
    %152 = vector.load %arg13[%c0_82, %c0_83] : memref<16x32xf32, #tpu.memory_space<vmem>>, vector<16x32xf32>
    tpu.vector_store %arg13[%c0_82, %c0_83], %151 {strides = array<i32>} : memref<16x32xf32, #tpu.memory_space<vmem>>, vector<16x32xf32>,
    return
  }
  func.func @transform_0(%arg0: i32) -> (i32, i32) {
    %c0_i32 = arith.constant 0 : i32
    %c0_i32_0 = arith.constant 0 : i32
    %c0_i32_1 = arith.constant 0 : i32
    return %c0_i32, %c0_i32_0 : i32, i32
  }
  func.func @transform_1(%arg0: i32) -> (i32, i32) {
    %c0_i32 = arith.constant 0 : i32
    %c0_i32_0 = arith.constant 0 : i32
    %c0_i32_1 = arith.constant 0 : i32
    return %c0_i32, %c0_i32_0 : i32, i32
  }
  func.func @transform_2(%arg0: i32) -> (i32, i32) {
    %c0_i32 = arith.constant 0 : i32
    %c0_i32_0 = arith.constant 0 : i32
    %c0_i32_1 = arith.constant 0 : i32
    return %c0_i32, %c0_i32_0 : i32, i32
  }
  func.func @transform_3(%arg0: i32) -> (i32, i32) {
    %c0_i32 = arith.constant 0 : i32
    %c0_i32_0 = arith.constant 0 : i32
    %c0_i32_1 = arith.constant 0 : i32
    return %c0_i32, %c0_i32_0 : i32, i32
  }
  func.func @transform_4(%arg0: i32) -> (i32, i32) {
    %c0_i32 = arith.constant 0 : i32
    %c0_i32_0 = arith.constant 0 : i32
    %c0_i32_1 = arith.constant 0 : i32
    return %c0_i32, %c0_i32_0 : i32, i32
  }
  func.func @transform_5(%arg0: i32) -> (i32, i32) {
    %c0_i32 = arith.constant 0 : i32
    %c0_i32_0 = arith.constant 0 : i32
    %c0_i32_1 = arith.constant 0 : i32
    return %c0_i32, %c0_i32_0 : i32, i32
  }
  func.func @transform_6(%arg0: i32) -> (i32, i32, i32) {
    %c0_i32 = arith.constant 0 : i32
    %c0_i32_0 = arith.constant 0 : i32
    %c0_i32_1 = arith.constant 0 : i32
    %c0_i32_2 = arith.constant 0 : i32
    return %c0_i32, %c0_i32_0, %c0_i32_1 : i32, i32, i32
  }
  func.func @transform_7(%arg0: i32) -> (i32, i32, i32) {
    %c0_i32 = arith.constant 0 : i32
    %c0_i32_0 = arith.constant 0 : i32
    %c0_i32_1 = arith.constant 0 : i32
    %c0_i32_2 = arith.constant 0 : i32
    return %c0_i32, %c0_i32_0, %c0_i32_1 : i32, i32, i32
  }
  func.func @transform_8(%arg0: i32) -> (i32, i32) {
    %c0_i32 = arith.constant 0 : i32
    %c0_i32_0 = arith.constant 0 : i32
    %c0_i32_1 = arith.constant 0 : i32
    return %c0_i32, %c0_i32_0 : i32, i32
  }
  func.func @transform_9(%arg0: i32) -> (i32, i32, i32) {
    %c0_i32 = arith.constant 0 : i32
    %c0_i32_0 = arith.constant 0 : i32
    %c0_i32_1 = arith.constant 0 : i32
    %c0_i32_2 = arith.constant 0 : i32
    return %c0_i32, %c0_i32_0, %c0_i32_1 : i32, i32, i32
  }
  func.func @transform_10(%arg0: i32) -> (i32, i32, i32) {
    %c0_i32 = arith.constant 0 : i32
    %c0_i32_0 = arith.constant 0 : i32
    %c0_i32_1 = arith.constant 0 : i32
    %c0_i32_2 = arith.constant 0 : i32
    return %c0_i32, %c0_i32_0, %c0_i32_1 : i32, i32, i32
  }
  func.func @transform_11(%arg0: i32) -> (i32, i32) {
    %c0_i32 = arith.constant 0 : i32
    %c0_i32_0 = arith.constant 0 : i32
    %c0_i32_1 = arith.constant 0 : i32
    return %c0_i32, %c0_i32_0 : i32, i32
  }
  func.func @transform_12(%arg0: i32) -> (i32, i32) {
    %c0_i32 = arith.constant 0 : i32
    %c0_i32_0 = arith.constant 0 : i32
    %c0_i32_1 = arith.constant 0 : i32
    return %c0_i32, %c0_i32_0 : i32, i32
  }
}

</mosaic_0001>

<bundles_post_ra>
// kernel: forward.1
= control target key start
LH: loop header
LB: loop body
LE: loop exit
PB: predicated region body
PF: predicated region fallthrough
CT: control target
= control target key end

     0   :  { %vm73_vm0 = vcmask 261120   ;;  %s3207_s0 = inlined_call_operand.vmem [shape: f32[16,32], index: 0, kind: input, shape index: {}]   ;;  %s3208_s1 = inlined_call_operand.vmem [shape: f32[16,64], index: 1, kind: input, shape index: {}]   ;;  %s3209_s2 = inlined_call_operand.vmem [shape: f32[64,16], index: 2, kind: input, shape index: {}]   ;;  %s3210_s3 = inlined_call_operand.vmem [shape: f32[64,32], index: 3, kind: input, shape index: {}]   ;;  %s3211_s4 = inlined_call_operand.vmem [shape: f32[64,64], index: 4, kind: input, shape index: {}]   ;;  %s3212_s5 = inlined_call_operand.vmem [shape: f32[2,32], index: 5, kind: input, shape index: {}, may-alias: {5,8}]   ;;  %s3213_s6 = inlined_call_operand.vmem [shape: f32[2,32,96], index: 6, kind: input, shape index: {}]   ;;  %s3214_s7 = inlined_call_operand.vmem [shape: f32[2,32,32], index: 7, kind: input, shape index: {}]   ;;  %s3215_s8 = inlined_call_operand.vmem [shape: f32[2,32], index: 8, kind: input, shape index: {}, may-alias: {5,8}]   ;;  %s3216_s9 = inlined_call_operand.vmem [shape: f32[2,32,64], index: 9, kind: input, shape index: {}]   ;;  %s3217_s10 = inlined_call_operand.vmem [shape: f32[2,64,32], index: 10, kind: input, shape index: {}]   ;;  %s3218_s11 = inlined_call_operand.vmem [shape: f32[1,32], index: 11, kind: input, shape index: {}]   ;;  %s3219_s12 = inlined_call_operand.hbm [shape: f32[16,32], index: 12, kind: output, shape index: {}]  }
   0x1   :  { %v2662_v0 = vld [vmem:[%s3207_s0] sm:$0xff]  ;;  %v2667_v1 = vld [vmem:[%s3207_s0 + $0x8] sm:$0xff] }
   0x2   :  { %17 = vsyncpa [#allocation3], 0  ;;  %v71_v2 = vmul.f32 %v2662_v0, %v2662_v0  ;;  %v72_v3 = vmul.f32 %v2667_v1, %v2667_v1  ;;  %v98_v6 = vld [vmem:[%s3213_s6 + $0x18] sm:$0xff]  ;;  %v97_v7 = vld [vmem:[%s3213_s6 + $0x10] sm:$0xff]  ;;  %vm188_vm1 = vcmask 130048   ;;  %s2589_s18 = smov 64  }
   0x3   :  { %2244 = vmatprep.subr.mxu1 %v98_v6  ;;  %v96_v8 = vld [vmem:[%s3213_s6 + $0x8] sm:$0xff]  ;;  %v95_v9 = vld [vmem:[%s3213_s6] sm:$0xff]  ;;  %s2590_s19 = smov 96   ;;  %v2721_v30 = vld [vmem:[%s3209_s2 + $0x10] sm:$0xff]  ;;  %vm548_vm2 = vcmask 523264  }
   0x4   :  { %v74_v4 = vsel %vm73_vm0, %v71_v2, 0.0  ;;  %v77_v5 = vsel %vm73_vm0, %v72_v3, 0.0  ;;  %2245 = vmatpush3.msra.mxu1 %v98_v6  ;;  %v1987_v17 = vld [vmem:[%s3212_s5] ss:$0 sm:$0xff]  ;;  %v2716_v29 = vld [vmem:[%s3209_s2 + $0x8] sm:$0xff]  ;;  %v2730_v31 = vld [vmem:[%s3209_s2 + $0x18] sm:$0xff] }
   0x5   :  { %75 = vadd.xlane.f32.xlu0 %v74_v4  ;;  %2246 = vmatprep.subr.mxu1 %v97_v7  ;;  %v2697_v23 = vld [vmem:[%s3209_s2] sm:$0xff]  ;;  %v2744_v33 = vld [vmem:[%s3209_s2 + $0x28] sm:$0xff]  ;;  %v2749_v34 = vld [vmem:[%s3209_s2 + $0x30] sm:$0xff] }
   0x6   :  { %2247 = vmatpush3.msra.mxu1 %v97_v7  ;;  %2275 = vmatprep.mubr.msk.f32.mxu0 %vm188_vm1, %v2697_v23  ;;  %v2735_v32 = vld [vmem:[%s3209_s2 + $0x20] sm:$0xff]  ;;  %v2758_v35 = vld [vmem:[%s3209_s2 + $0x38] sm:$0xff]  ;;  %v2772_v44 = vld [vmem:[%s3210_s3 + $0x30] sm:$0xff] }
   0x7   :  { %2248 = vmatprep.subr.mxu1 %v96_v8  ;;  %v2767_v42 = vld [vmem:[%s3210_s3 + $0x38] sm:$0xff]  ;;  %v2780_v48 = vld [vmem:[%s3210_s3 + $0x28] sm:$0xff]  ;;  %v2788_v50 = vld [vmem:[%s3210_s3 + $0x20] sm:$0xff] }
   0x8   :  { %2249 = vmatpush3.msra.mxu1 %v96_v8  ;;  %v2796_v52 = vld [vmem:[%s3210_s3 + $0x18] sm:$0xff]  ;;  %v2804_v54 = vld [vmem:[%s3210_s3 + $0x10] sm:$0xff]  ;;  %v2812_v56 = vld [vmem:[%s3210_s3 + $0x8] sm:$0xff] }
   0x9   :  { %78 = vadd.xlane.f32.xlu0 %v77_v5  ;;  %2250 = vmatprep.subr.mxu1 %v95_v9  ;;  %v2820_v58 = vld [vmem:[%s3210_s3] sm:$0xff]  ;;  %v2833_v60 = vld [vmem:[%s3208_s1 + $0x8] sm:$0xff] }
   0xa   :  { %2251 = vmatpush3.msra.mxu1 %v95_v9  ;;  %v2838_v62 = vld [vmem:[%s3208_s1] sm:$0xff]  ;;  %s2591_s1 = smov [#allocation2]  }
  0x8e   :  { %v76_v10 = vpop.xlane.xlu0 %75 }
  0x8f   :  { %v81_v11 = vmul.f32 0.03125, %v76_v10 }
  0x91   :  { %v83_v12 = vadd.f32 1e-06, %v81_v11 }
  0x92   :  { %v79_v13 = vpop.xlane.xlu0 %78 }
  0x93   :  { %2531 = vrsqrt.f32 %v83_v12  ;;  %v82_v14 = vmul.f32 0.03125, %v79_v13  ;;  %v2849_v12 = vld [vmem:[%s3211_s4 + $0x38] sm:$0xff] }
  0x95   :  { %v84_v15 = vadd.f32 1e-06, %v82_v14  ;;  %v2854_v14 = vld [vmem:[%s3211_s4 + $0x30] sm:$0xff] }
  0x97   :  { %2533 = vrsqrt.f32 %v84_v15  ;;  %v2865_v15 = vld [vmem:[%s3211_s4 + $0x28] sm:$0xff] }
  0xa0   :  { %v2532_v16 = vpop.eup %2531 }
  0xa1   :  { %v87_v18 = vmul.f32 %v2532_v16, %v2662_v0  ;;  %v2872_v16 = vld [vmem:[%s3211_s4 + $0x20] sm:$0xff] }
  0xa3   :  { %v93_v19 = vmul.f32 %v1987_v17, %v87_v18  ;;  %v2890_v18 = vld [vmem:[%s3211_s4 + $0x10] sm:$0xff] }
  0xa4   :  { %v2534_v20 = vpop.eup %2533 }
  0xa5   :  { %v88_v21 = vmul.f32 %v2534_v20, %v2667_v1  ;;  %2252 = vmatprep.mubr.msk.f32.mxu1 %vm73_vm0, %v93_v19  ;;  %v2901_v19 = vld [vmem:[%s3211_s4 + $0x8] sm:$0xff] }
  0xa7   :  { %v94_v22 = vmul.f32 %v1987_v17, %v88_v21  ;;  %v2883_v17 = vld [vmem:[%s3211_s4 + $0x18] sm:$0xff]  ;;  %v2908_v21 = vld [vmem:[%s3211_s4] sm:$0xff] }
  0xa9   :  { %2253 = vmatmul.mubr.msk.f32.vlgmr.msra.gmra.mxu1 %vm73_vm0, %v94_v22 }
  0xaa   :  { %2259 = vmatprep.mubr.msk.f32.mxu1 %vm188_vm1, %v2697_v23 }
 0x169   :  { %v2703_v24 = vpop.f32.mrf.mxu1 }
 0x16a   :  { %328 = vrot.lane.b32.xlu0 %v2703_v24, %s2589_s18  ;;  %184 = vrot.lane.b32.xlu1 %v2703_v24, %s2590_s19 }
 0x16b   :  { %v2709_v25 = vpop.f32.mrf.mxu1 }
 0x16e   :  { %182 = vrot.lane.b32.xlu1 %v2709_v25, %s2590_s19 }
 0x1dc   :  { %v329_v26 = vpop.permute.xlu0 %328  ;;  %v185_v27 = vpop.permute.xlu1 %184 }
 0x1dd   :  { %2255 = vmatprep.subr.mxu1 %v185_v27  ;;  %2271 = vmatprep.subr.mxu0 %v329_v26 }
 0x1de   :  { %2256 = vmatpush3.msra.mxu1 %v185_v27  ;;  %2272 = vmatpush3.msra.mxu0 %v329_v26 }
 0x1e0   :  { %v183_v28 = vpop.permute.xlu1 %182 }
 0x1e1   :  { %2257 = vmatprep.subr.mxu1 %v183_v28 }
 0x1e2   :  { %2258 = vmatpush3.msra.mxu1 %v183_v28 }
 0x1e3   :  { %2260 = vmatmul.mubr.msk.f32.vlgmr.msra.gmra.mxu1 %vm188_vm1, %v2716_v29 }
 0x1e4   :  { %2262 = vmatprep.mubr.msk.f32.mxu1 %vm188_vm1, %v2721_v30 }
 0x1e7   :  { %2263 = vmatmul.mubr.msk.f32.gmra.mxu1 %vm188_vm1, %v2730_v31 }
 0x1e8   :  { %2265 = vmatprep.mubr.msk.f32.mxu1 %vm188_vm1, %v2735_v32 }
 0x1eb   :  { %2266 = vmatmul.mubr.msk.f32.gmra.mxu1 %vm188_vm1, %v2744_v33 }
 0x1ec   :  { %2268 = vmatprep.mubr.msk.f32.mxu1 %vm188_vm1, %v2749_v34 }
 0x1ef   :  { %2269 = vmatmul.mubr.msk.f32.gmra.mxu1 %vm188_vm1, %v2758_v35 }
 0x1f0   :  { %2303 = vmatprep.mubr.msk.f32.mxu1 %vm73_vm0, %v2709_v25 }
 0x2a3   :  { %v2261_v36 = vpop.f32.mrf.mxu1 }
 0x2a4   :  { %v319_v57 = vmul.f32 %v2261_v36, %v2812_v56 }
 0x2a5   :  { %v279_v37 = vpop.f32.mrf.mxu1 }
 0x2a6   :  { %v318_v59 = vmul.f32 %v279_v37, %v2820_v58 }
 0x2a7   :  { %v2264_v38 = vpop.f32.mrf.mxu1 }
 0x2a8   :  { %v321_v53 = vmul.f32 %v2264_v38, %v2796_v52 }
 0x2a9   :  { %v289_v39 = vpop.f32.mrf.mxu1 }
 0x2aa   :  { %v320_v55 = vmul.f32 %v289_v39, %v2804_v54 }
 0x2ab   :  { %v2267_v40 = vpop.f32.mrf.mxu1 }
 0x2ac   :  { %v323_v49 = vmul.f32 %v2267_v40, %v2780_v48 }
 0x2ad   :  { %v299_v41 = vpop.f32.mrf.mxu1 }
 0x2ae   :  { %v322_v51 = vmul.f32 %v299_v41, %v2788_v50 }
 0x2af   :  { %v2270_v43 = vpop.f32.mrf.mxu1 }
 0x2b0   :  { %v325_v45 = vmul.f32 %v2270_v43, %v2767_v42 }
 0x2b1   :  { %v309_v46 = vpop.f32.mrf.mxu1 }
 0x2b2   :  { %v324_v47 = vmul.f32 %v309_v46, %v2772_v44  ;;  %2287 = vmatprep.subr.msk.mxu1 %vm73_vm0, %v325_v45 }
 0x2b3   :  { %2288 = vmatpush3.xpose.msk.msra.mxu1 %vm73_vm0, %v325_v45 }
 0x2b4   :  { %2289 = vmatprep.subr.msk.mxu1 %vm73_vm0, %v324_v47 }
 0x2b7   :  { %2290 = vmatpush3.xpose.msk.msra.mxu1 %vm73_vm0, %v324_v47 }
 0x2b8   :  { %2291 = vmatprep.subr.msk.mxu1 %vm73_vm0, %v323_v49 }
 0x2bb   :  { %2292 = vmatpush3.xpose.msk.msra.mxu1 %vm73_vm0, %v323_v49 }
 0x2bc   :  { %2293 = vmatprep.subr.msk.mxu1 %vm73_vm0, %v322_v51 }
 0x2bf   :  { %2294 = vmatpush3.xpose.msk.msra.mxu1 %vm73_vm0, %v322_v51 }
 0x2c0   :  { %2295 = vmatprep.subr.msk.mxu1 %vm73_vm0, %v321_v53 }
 0x2c3   :  { %2296 = vmatpush3.xpose.msk.msra.mxu1 %vm73_vm0, %v321_v53 }
 0x2c4   :  { %2297 = vmatprep.subr.msk.mxu1 %vm73_vm0, %v320_v55 }
 0x2c7   :  { %2298 = vmatpush3.xpose.msk.msra.mxu1 %vm73_vm0, %v320_v55 }
 0x2c8   :  { %2299 = vmatprep.subr.msk.mxu1 %vm73_vm0, %v319_v57 }
 0x2cb   :  { %2300 = vmatpush3.xpose.msk.msra.mxu1 %vm73_vm0, %v319_v57 }
 0x2cc   :  { %2301 = vmatprep.subr.msk.mxu1 %vm73_vm0, %v318_v59 }
 0x2cf   :  { %2302 = vmatpush3.xpose.msk.msra.mxu1 %vm73_vm0, %v318_v59 }
 0x2d2   :  { %2304 = vmatmul.mubr.msk.f32.vlgmr.msra.gmra.mxu1 %vm73_vm0, %v2703_v24  ;;  %v734_v24 = vld [vmem:[%s3214_s7 + $0x18] sm:$0xff] }
 0x2d3   :  { %2344 = vmatprep.subr.mxu1 %v734_v24 }
 0x2d4   :  { %2345 = vmatpush3.msra.mxu1 %v734_v24 }
 0x392   :  { %v2305_v61 = vpop.f32.mrf.mxu1 }
 0x393   :  { %v545_v63 = vadd.f32 %v2305_v61, %v2833_v60 }
 0x394   :  { %v539_v2 = vpop.f32.mrf.mxu1 }
 0x395   :  { %v540_v3 = vadd.f32 %v539_v2, %v2838_v62  ;;  %v552_v4 = vsel %vm548_vm2, %v545_v63, -inf }
 0x396   :  { %553 = vmax.xlane.f32.xlu1 %v552_v4 }
 0x397   :  { %v549_v5 = vsel %vm548_vm2, %v540_v3, -inf }
 0x398   :  { %550 = vmax.xlane.f32.xlu0 %v549_v5  ;;  %v732_v5 = vld [vmem:[%s3214_s7 + $0x8] sm:$0xff] }
 0x3ae   :  { %326 = vrot.lane.b32.xlu0 %v2709_v25, %s2589_s18  ;;  %v733_v25 = vld [vmem:[%s3214_s7 + $0x10] sm:$0xff] }
 0x3af   :  { %2346 = vmatprep.subr.mxu1 %v733_v25 }
 0x3b0   :  { %2347 = vmatpush3.msra.mxu1 %v733_v25 }
 0x3b1   :  { %2348 = vmatprep.subr.mxu1 %v732_v5 }
 0x3b2   :  { %2349 = vmatpush3.msra.mxu1 %v732_v5 }
 0x41f   :  { %v554_v6 = vpop.xlane.xlu1 %553 }
 0x420   :  { %v556_v8 = vsub.f32 %v545_v63, %v554_v6  ;;  %v731_v6 = vld [vmem:[%s3214_s7] sm:$0xff] }
 0x421   :  { %v551_v7 = vpop.xlane.xlu0 %550  ;;  %2350 = vmatprep.subr.mxu1 %v731_v6 }
 0x422   :  { %v555_v9 = vsub.f32 %v540_v3, %v551_v7  ;;  %v559_v13 = vmul.f32 1.442695, %v556_v8  ;;  %2351 = vmatpush3.msra.mxu1 %v731_v6 }
 0x424   :  { %v557_v10 = vmul.f32 1.442695, %v555_v9 }
 0x425   :  { %v327_v11 = vpop.permute.xlu0 %326 }
 0x426   :  { %2535 = vpow2.f32 %v557_v10  ;;  %2273 = vmatprep.subr.mxu0 %v327_v11 }
 0x427   :  { %2274 = vmatpush3.msra.mxu0 %v327_v11  ;;  %2537 = vpow2.f32 %v559_v13 }
 0x428   :  { %2276 = vmatmul.mubr.msk.f32.vlgmr.msra.gmra.mxu0 %vm188_vm1, %v2716_v29  ;;  %2306 = vmatprep.subr.mxu0 %v2849_v12 }
 0x429   :  { %2307 = vmatpush3.msra.mxu0 %v2849_v12  ;;  %2278 = vmatprep.mubr.msk.f32.mxu0 %vm188_vm1, %v2721_v30 }
 0x42a   :  { %2308 = vmatprep.subr.mxu0 %v2854_v14 }
 0x42b   :  { %2309 = vmatpush3.msra.mxu0 %v2854_v14 }
 0x42c   :  { %2279 = vmatmul.mubr.msk.f32.gmra.mxu0 %vm188_vm1, %v2730_v31  ;;  %2310 = vmatprep.subr.mxu0 %v2865_v15 }
 0x42d   :  { %2311 = vmatpush3.msra.mxu0 %v2865_v15  ;;  %2281 = vmatprep.mubr.msk.f32.mxu0 %vm188_vm1, %v2735_v32 }
 0x42e   :  { %2312 = vmatprep.subr.mxu0 %v2872_v16 }
 0x42f   :  { %2313 = vmatpush3.msra.mxu0 %v2872_v16 }
 0x430   :  { %2282 = vmatmul.mubr.msk.f32.gmra.mxu0 %vm188_vm1, %v2744_v33  ;;  %2314 = vmatprep.subr.mxu0 %v2883_v17 }
 0x431   :  { %2315 = vmatpush3.msra.mxu0 %v2883_v17  ;;  %2284 = vmatprep.mubr.msk.f32.mxu0 %vm188_vm1, %v2749_v34 }
 0x432   :  { %2316 = vmatprep.subr.mxu0 %v2890_v18 }
 0x433   :  { %v2536_v20 = vpop.eup %2535  ;;  %2317 = vmatpush3.msra.mxu0 %v2890_v18 }
 0x434   :  { %2285 = vmatmul.mubr.msk.f32.gmra.mxu0 %vm188_vm1, %v2758_v35  ;;  %2318 = vmatprep.subr.mxu0 %v2901_v19  ;;  %v2538_v22 = vpop.eup %2537 }
 0x435   :  { %2319 = vmatpush3.msra.mxu0 %v2901_v19  ;;  %2322 = vmatprep.mubr.msk.f32.mxu0 %vm548_vm2, %v2536_v20 }
 0x436   :  { %2320 = vmatprep.subr.mxu0 %v2908_v21 }
 0x437   :  { %2321 = vmatpush3.msra.mxu0 %v2908_v21 }
 0x438   :  { %2323 = vmatmul.mubr.msk.f32.vlgmr.msra.gmra.mxu0 %vm548_vm2, %v2538_v22 }
 0x4e8   :  { %v2277_v26 = vpop.f32.mrf.mxu0 }
 0x4e9   :  { %v438_v59 = vmul.f32 %v2277_v26, %v2812_v56  ;;  %v842_v26 = vld [vmem:[%s3216_s9 + $0x8] sm:$0xff] }
 0x4ea   :  { %v398_v27 = vpop.f32.mrf.mxu0 }
 0x4eb   :  { %v437_v61 = vmul.f32 %v398_v27, %v2820_v58  ;;  %v841_v27 = vld [vmem:[%s3216_s9] sm:$0xff] }
 0x4ec   :  { %v2280_v28 = vpop.f32.mrf.mxu0 }
 0x4ed   :  { %v440_v55 = vmul.f32 %v2280_v28, %v2796_v52  ;;  %v935_v28 = vld [vmem:[%s3217_s10 + $0x38] sm:$0xff] }
 0x4ee   :  { %v408_v36 = vpop.f32.mrf.mxu0  ;;  %2366 = vmatprep.subr.mxu1 %v935_v28 }
 0x4ef   :  { %v439_v57 = vmul.f32 %v408_v36, %v2804_v54  ;;  %v934_v36 = vld [vmem:[%s3217_s10 + $0x30] sm:$0xff] }
 0x4f0   :  { %v2283_v37 = vpop.f32.mrf.mxu0 }
 0x4f1   :  { %v442_v46 = vmul.f32 %v2283_v37, %v2780_v48  ;;  %v933_v37 = vld [vmem:[%s3217_s10 + $0x28] sm:$0xff] }
 0x4f2   :  { %v418_v38 = vpop.f32.mrf.mxu0 }
 0x4f3   :  { %v441_v51 = vmul.f32 %v418_v38, %v2788_v50  ;;  %v932_v38 = vld [vmem:[%s3217_s10 + $0x20] sm:$0xff] }
 0x4f4   :  { %v2286_v39 = vpop.f32.mrf.mxu0 }
 0x4f5   :  { %v444_v40 = vmul.f32 %v2286_v39, %v2767_v42  ;;  %v931_v39 = vld [vmem:[%s3217_s10 + $0x18] sm:$0xff] }
 0x4f6   :  { %v428_v41 = vpop.f32.mrf.mxu0 }
 0x4f7   :  { %v443_v43 = vmul.f32 %v428_v41, %v2772_v44  ;;  %2325 = vmatprep.subr.mxu0 %v444_v40 }
 0x4f8   :  { %v2324_v45 = vpop.f32.mrf.mxu0  ;;  %2326 = vmatpush3.msra.mxu0 %v444_v40 }
 0x4f9   :  { %vm643_vm3 = vcmp.gt.f32.partialorder %v2324_v45, 0.0  ;;  %2327 = vmatprep.subr.mxu0 %v443_v43 }
 0x4fa   :  { %v645_v47 = vsel %vm643_vm3, %v2324_v45, 1.0  ;;  %v633_v49 = vpop.f32.mrf.mxu0  ;;  %2328 = vmatpush3.msra.mxu0 %v443_v43 }
 0x4fb   :  { %vm642_vm4 = vcmp.gt.f32.partialorder %v633_v49, 0.0  ;;  %2329 = vmatprep.subr.mxu0 %v442_v46  ;;  %2539 = vrcp.f32 %v645_v47 }
 0x4fc   :  { %v644_v53 = vsel %vm642_vm4, %v633_v49, 1.0  ;;  %2330 = vmatpush3.msra.mxu0 %v442_v46 }
 0x4fd   :  { %2541 = vrcp.f32 %v644_v53  ;;  %2331 = vmatprep.subr.mxu0 %v441_v51 }
 0x4fe   :  { %2332 = vmatpush3.msra.mxu0 %v441_v51 }
 0x4ff   :  { %2333 = vmatprep.subr.mxu0 %v440_v55 }
 0x500   :  { %2334 = vmatpush3.msra.mxu0 %v440_v55  ;;  %v2022_v55 = vld [vmem:[%s3215_s8] ss:$0 sm:$0xff] }
 0x501   :  { %2335 = vmatprep.subr.mxu0 %v439_v57 }
 0x502   :  { %2336 = vmatpush3.msra.mxu0 %v439_v57 }
 0x503   :  { %2337 = vmatprep.subr.mxu0 %v438_v59 }
 0x504   :  { %2338 = vmatpush3.msra.mxu0 %v438_v59 }
 0x505   :  { %2339 = vmatprep.subr.mxu0 %v437_v61 }
 0x506   :  { %2340 = vmatpush3.msra.mxu0 %v437_v61 }
 0x508   :  { %v2540_v63 = vpop.eup %2539 }
 0x509   :  { %v649_v4 = vmul.f32 %v2540_v63, %v2538_v22  ;;  %v930_v63 = vld [vmem:[%s3217_s10 + $0x10] sm:$0xff] }
 0x50a   :  { %v2542_v2 = vpop.eup %2541 }
 0x50b   :  { %v647_v3 = vmul.f32 %v2542_v2, %v2536_v20  ;;  %v929_v2 = vld [vmem:[%s3217_s10 + $0x8] sm:$0xff] }
 0x50d   :  { %2341 = vmatprep.mubr.msk.f32.mxu0 %vm548_vm2, %v647_v3  ;;  %v928_v3 = vld [vmem:[%s3217_s10] sm:$0xff] }
 0x50e   :  { %2342 = vmatmul.mubr.msk.f32.vlgmr.msra.gmra.mxu0 %vm548_vm2, %v649_v4 }
 0x5ce   :  { %v2343_v7 = vpop.f32.mrf.mxu0 }
 0x5d0   :  { %v722_v8 = vpop.f32.mrf.mxu0 }
 0x5d1   :  { %2352 = vmatprep.mubr.msk.f32.mxu1 %vm73_vm0, %v722_v8 }
 0x5d2   :  { %2353 = vmatmul.mubr.msk.f32.vlgmr.msra.gmra.mxu1 %vm73_vm0, %v2343_v7 }
 0x5d3   :  { %2367 = vmatpush3.msra.mxu1 %v935_v28 }
 0x5d4   :  { %2368 = vmatprep.subr.mxu1 %v934_v36 }
 0x5d5   :  { %2369 = vmatpush3.msra.mxu1 %v934_v36 }
 0x5d6   :  { %2370 = vmatprep.subr.mxu1 %v933_v37 }
 0x5d7   :  { %2371 = vmatpush3.msra.mxu1 %v933_v37 }
 0x5d8   :  { %2372 = vmatprep.subr.mxu1 %v932_v38 }
 0x5d9   :  { %2373 = vmatpush3.msra.mxu1 %v932_v38 }
 0x5da   :  { %2374 = vmatprep.subr.mxu1 %v931_v39 }
 0x5db   :  { %2375 = vmatpush3.msra.mxu1 %v931_v39 }
 0x5dc   :  { %2376 = vmatprep.subr.mxu1 %v930_v63 }
 0x5dd   :  { %2377 = vmatpush3.msra.mxu1 %v930_v63 }
 0x5de   :  { %2378 = vmatprep.subr.mxu1 %v929_v2 }
 0x5df   :  { %2379 = vmatpush3.msra.mxu1 %v929_v2 }
 0x5e0   :  { %2380 = vmatprep.subr.mxu1 %v928_v3 }
 0x5e1   :  { %2381 = vmatpush3.msra.mxu1 %v928_v3 }
 0x692   :  { %v2354_v9 = vpop.f32.mrf.mxu1 }
 0x693   :  { %v2943_v10 = vadd.f32 %v2354_v9, %v2667_v1  ;;  %v844_v1 = vld [vmem:[%s3216_s9 + $0x18] sm:$0xff] }
 0x694   :  { %v807_v11 = vpop.f32.mrf.mxu1  ;;  %2355 = vmatprep.subr.mxu0 %v844_v1 }
 0x695   :  { %v2946_v13 = vadd.f32 %v807_v11, %v2662_v0  ;;  %v820_v20 = vmul.f32 %v2943_v10, %v2943_v10  ;;  %v843_v0 = vld [vmem:[%s3216_s9 + $0x10] sm:$0xff]  ;;  %2356 = vmatpush3.msra.mxu0 %v844_v1 }
 0x696   :  { %2357 = vmatprep.subr.mxu0 %v843_v0 }
 0x697   :  { %v824_v22 = vsel %vm73_vm0, %v820_v20, 0.0  ;;  %v819_v24 = vmul.f32 %v2946_v13, %v2946_v13  ;;  %2358 = vmatpush3.msra.mxu0 %v843_v0  ;;  %v2029_v0 = vld [vmem:[%s3213_s6 + $0x28] sm:$0xff] }
 0x698   :  { %825 = vadd.xlane.f32.xlu1 %v824_v22  ;;  %2359 = vmatprep.subr.mxu0 %v842_v26 }
 0x699   :  { %v821_v25 = vsel %vm73_vm0, %v819_v24, 0.0  ;;  %2360 = vmatpush3.msra.mxu0 %v842_v26  ;;  %v2028_v26 = vld [vmem:[%s3213_s6 + $0x20] sm:$0xff] }
 0x69a   :  { %822 = vadd.xlane.f32.xlu0 %v821_v25  ;;  %2361 = vmatprep.subr.mxu0 %v841_v27 }
 0x69b   :  { %2362 = vmatpush3.msra.mxu0 %v841_v27 }
 0x721   :  { %v826_v40 = vpop.xlane.xlu1 %825 }
 0x722   :  { %v828_v41 = vmul.f32 0.03125, %v826_v40 }
 0x723   :  { %v823_v43 = vpop.xlane.xlu0 %822 }
 0x724   :  { %v830_v45 = vadd.f32 1e-06, %v828_v41  ;;  %v827_v46 = vmul.f32 0.03125, %v823_v43  ;;  %v2027_v41 = vld [vmem:[%s3212_s5 + $0x1] ss:$0 sm:$0xff] }
 0x726   :  { %2543 = vrsqrt.f32 %v830_v45  ;;  %v829_v47 = vadd.f32 1e-06, %v827_v46 }
 0x728   :  { %2545 = vrsqrt.f32 %v829_v47 }
 0x733   :  { %v2544_v49 = vpop.eup %2543 }
 0x734   :  { %v834_v53 = vmul.f32 %v2544_v49, %v2943_v10 }
 0x735   :  { %v2546_v51 = vpop.eup %2545 }
 0x736   :  { %v833_v57 = vmul.f32 %v2546_v51, %v2946_v13  ;;  %v840_v61 = vmul.f32 %v2022_v55, %v834_v53 }
 0x738   :  { %v839_v59 = vmul.f32 %v2022_v55, %v833_v57 }
 0x73a   :  { %2363 = vmatprep.mubr.msk.f32.mxu0 %vm73_vm0, %v839_v59 }
 0x73b   :  { %2364 = vmatmul.mubr.msk.f32.vlgmr.msra.gmra.mxu0 %vm73_vm0, %v840_v61 }
 0x7fb   :  { %v2365_v4 = vpop.f32.mrf.mxu0 }
 0x7fc   :  { %v927_v7 = vmax.f32 %v2365_v4, 0.0 }
 0x7fd   :  { %v917_v5 = vpop.f32.mrf.mxu0 }
 0x7fe   :  { %v926_v6 = vmax.f32 %v917_v5, 0.0 }
 0x800   :  { %2382 = vmatprep.mubr.msk.f32.mxu1 %vm548_vm2, %v926_v6 }
 0x801   :  { %2383 = vmatmul.mubr.msk.f32.vlgmr.msra.gmra.mxu1 %vm548_vm2, %v927_v7 }
 0x802   :  { %2416 = vmatprep.mubr.msk.f32.mxu1 %vm188_vm1, %v2697_v23 }
 0x8c1   :  { %v2384_v8 = vpop.f32.mrf.mxu1 }
 0x8c2   :  { %v3002_v11 = vadd.f32 %v2384_v8, %v2943_v10  ;;  %v2031_v10 = vld [vmem:[%s3213_s6 + $0x38] sm:$0xff] }
 0x8c3   :  { %v1008_v9 = vpop.f32.mrf.mxu1  ;;  %2385 = vmatprep.subr.mxu0 %v2031_v10 }
 0x8c4   :  { %v3005_v20 = vadd.f32 %v1008_v9, %v2946_v13  ;;  %v1021_v25 = vmul.f32 %v3002_v11, %v3002_v11  ;;  %v2030_v13 = vld [vmem:[%s3213_s6 + $0x30] sm:$0xff]  ;;  %2386 = vmatpush3.msra.mxu0 %v2031_v10 }
 0x8c5   :  { %2387 = vmatprep.subr.mxu0 %v2030_v13 }
 0x8c6   :  { %v1020_v22 = vmul.f32 %v3005_v20, %v3005_v20  ;;  %v1025_v1 = vsel %vm73_vm0, %v1021_v25, 0.0  ;;  %2388 = vmatpush3.msra.mxu0 %v2030_v13 }
 0x8c7   :  { %2389 = vmatprep.subr.mxu0 %v2029_v0 }
 0x8c8   :  { %v1022_v24 = vsel %vm73_vm0, %v1020_v22, 0.0  ;;  %2390 = vmatpush3.msra.mxu0 %v2029_v0 }
 0x8c9   :  { %1023 = vadd.xlane.f32.xlu1 %v1022_v24  ;;  %2391 = vmatprep.subr.mxu0 %v2028_v26 }
 0x8ca   :  { %2392 = vmatpush3.msra.mxu0 %v2028_v26 }
 0x8cd   :  { %1026 = vadd.xlane.f32.xlu1 %v1025_v1 }
 0x952   :  { %v1024_v27 = vpop.xlane.xlu1 %1023 }
 0x953   :  { %v1028_v28 = vmul.f32 0.03125, %v1024_v27 }
 0x955   :  { %v1030_v36 = vadd.f32 1e-06, %v1028_v28 }
 0x956   :  { %v1027_v37 = vpop.xlane.xlu1 %1026 }
 0x957   :  { %2547 = vrsqrt.f32 %v1030_v36  ;;  %v1029_v38 = vmul.f32 0.03125, %v1027_v37 }
 0x959   :  { %v1031_v39 = vadd.f32 1e-06, %v1029_v38 }
 0x95b   :  { %2549 = vrsqrt.f32 %v1031_v39 }
 0x964   :  { %v2548_v40 = vpop.eup %2547 }
 0x965   :  { %v1034_v43 = vmul.f32 %v2548_v40, %v3005_v20 }
 0x967   :  { %v1040_v45 = vmul.f32 %v2027_v41, %v1034_v43 }
 0x968   :  { %v2550_v46 = vpop.eup %2549 }
 0x969   :  { %v1035_v47 = vmul.f32 %v2550_v46, %v3002_v11  ;;  %2393 = vmatprep.mubr.msk.f32.mxu0 %vm73_vm0, %v1040_v45 }
 0x96b   :  { %v1041_v49 = vmul.f32 %v2027_v41, %v1035_v47 }
 0x96d   :  { %2394 = vmatmul.mubr.msk.f32.vlgmr.msra.gmra.mxu0 %vm73_vm0, %v1041_v49 }
 0x96e   :  { %2400 = vmatprep.mubr.msk.f32.mxu0 %vm188_vm1, %v2697_v23 }
 0xa2d   :  { %v2395_v51 = vpop.f32.mrf.mxu0 }
 0xa2e   :  { %1132 = vrot.lane.b32.xlu1 %v2395_v51, %s2590_s19 }
 0xa2f   :  { %v1119_v53 = vpop.f32.mrf.mxu0 }
 0xa30   :  { %1130 = vrot.lane.b32.xlu0 %v1119_v53, %s2590_s19 }
 0xaa0   :  { %v1133_v55 = vpop.permute.xlu1 %1132 }
 0xaa1   :  { %2396 = vmatprep.subr.mxu0 %v1133_v55 }
 0xaa2   :  { %2397 = vmatpush3.msra.mxu0 %v1133_v55  ;;  %v1131_v57 = vpop.permute.xlu0 %1130 }
 0xaa3   :  { %2398 = vmatprep.subr.mxu0 %v1131_v57 }
 0xaa4   :  { %2399 = vmatpush3.msra.mxu0 %v1131_v57 }
 0xaa5   :  { %2401 = vmatmul.mubr.msk.f32.vlgmr.msra.gmra.mxu0 %vm188_vm1, %v2716_v29 }
 0xaa6   :  { %2403 = vmatprep.mubr.msk.f32.mxu0 %vm188_vm1, %v2721_v30 }
 0xaa9   :  { %2404 = vmatmul.mubr.msk.f32.gmra.mxu0 %vm188_vm1, %v2730_v31 }
 0xaaa   :  { %2406 = vmatprep.mubr.msk.f32.mxu0 %vm188_vm1, %v2735_v32 }
 0xaad   :  { %2407 = vmatmul.mubr.msk.f32.gmra.mxu0 %vm188_vm1, %v2744_v33 }
 0xaae   :  { %2409 = vmatprep.mubr.msk.f32.mxu0 %vm188_vm1, %v2749_v34 }
 0xab1   :  { %2410 = vmatmul.mubr.msk.f32.gmra.mxu0 %vm188_vm1, %v2758_v35 }
 0xab2   :  { %2444 = vmatprep.mubr.msk.f32.mxu0 %vm73_vm0, %v1119_v53 }
 0xb65   :  { %v2402_v23 = vpop.f32.mrf.mxu0 }
 0xb66   :  { %v1242_v25 = vmul.f32 %v2402_v23, %v2812_v56 }
 0xb67   :  { %v1202_v59 = vpop.f32.mrf.mxu0 }
 0xb68   :  { %v1241_v1 = vmul.f32 %v1202_v59, %v2820_v58 }
 0xb69   :  { %v2405_v61 = vpop.f32.mrf.mxu0 }
 0xb6a   :  { %v1244_v22 = vmul.f32 %v2405_v61, %v2796_v52 }
 0xb6b   :  { %v1212_v63 = vpop.f32.mrf.mxu0 }
 0xb6c   :  { %v1243_v24 = vmul.f32 %v1212_v63, %v2804_v54 }
 0xb6d   :  { %v2408_v2 = vpop.f32.mrf.mxu0 }
 0xb6e   :  { %v1246_v8 = vmul.f32 %v2408_v2, %v2780_v48 }
 0xb6f   :  { %v1222_v3 = vpop.f32.mrf.mxu0 }
 0xb70   :  { %v1245_v9 = vmul.f32 %v1222_v3, %v2788_v50 }
 0xb71   :  { %v2411_v4 = vpop.f32.mrf.mxu0 }
 0xb72   :  { %v1248_v5 = vmul.f32 %v2411_v4, %v2767_v42 }
 0xb73   :  { %v1232_v6 = vpop.f32.mrf.mxu0 }
 0xb74   :  { %v1247_v7 = vmul.f32 %v1232_v6, %v2772_v44  ;;  %2428 = vmatprep.subr.msk.mxu0 %vm73_vm0, %v1248_v5  ;;  %v2072_v6 = vld [vmem:[%s3216_s9 + $0x28] sm:$0xff] }
 0xb75   :  { %2429 = vmatpush3.xpose.msk.msra.mxu0 %vm73_vm0, %v1248_v5 }
 0xb76   :  { %2430 = vmatprep.subr.msk.mxu0 %vm73_vm0, %v1247_v7 }
 0xb79   :  { %2431 = vmatpush3.xpose.msk.msra.mxu0 %vm73_vm0, %v1247_v7  ;;  %v2071_v7 = vld [vmem:[%s3216_s9 + $0x20] sm:$0xff] }
 0xb7a   :  { %2432 = vmatprep.subr.msk.mxu0 %vm73_vm0, %v1246_v8 }
 0xb7d   :  { %2433 = vmatpush3.xpose.msk.msra.mxu0 %vm73_vm0, %v1246_v8  ;;  %v2084_v8 = vld [vmem:[%s3217_s10 + $0x78] sm:$0xff] }
 0xb7e   :  { %2434 = vmatprep.subr.msk.mxu0 %vm73_vm0, %v1245_v9 }
 0xb81   :  { %2435 = vmatpush3.xpose.msk.msra.mxu0 %vm73_vm0, %v1245_v9  ;;  %v2083_v9 = vld [vmem:[%s3217_s10 + $0x70] sm:$0xff] }
 0xb82   :  { %2436 = vmatprep.subr.msk.mxu0 %vm73_vm0, %v1244_v22 }
 0xb85   :  { %2437 = vmatpush3.xpose.msk.msra.mxu0 %vm73_vm0, %v1244_v22  ;;  %v2082_v22 = vld [vmem:[%s3217_s10 + $0x68] sm:$0xff] }
 0xb86   :  { %2438 = vmatprep.subr.msk.mxu0 %vm73_vm0, %v1243_v24 }
 0xb89   :  { %2439 = vmatpush3.xpose.msk.msra.mxu0 %vm73_vm0, %v1243_v24  ;;  %v2081_v24 = vld [vmem:[%s3217_s10 + $0x60] sm:$0xff] }
 0xb8a   :  { %2440 = vmatprep.subr.msk.mxu0 %vm73_vm0, %v1242_v25 }
 0xb8d   :  { %2441 = vmatpush3.xpose.msk.msra.mxu0 %vm73_vm0, %v1242_v25  ;;  %v2080_v25 = vld [vmem:[%s3217_s10 + $0x58] sm:$0xff] }
 0xb8e   :  { %2442 = vmatprep.subr.msk.mxu0 %vm73_vm0, %v1241_v1 }
 0xb91   :  { %2443 = vmatpush3.xpose.msk.msra.mxu0 %vm73_vm0, %v1241_v1 }
 0xb94   :  { %2445 = vmatmul.mubr.msk.f32.vlgmr.msra.gmra.mxu0 %vm73_vm0, %v2395_v51 }
 0xc54   :  { %v2446_v10 = vpop.f32.mrf.mxu0 }
 0xc55   :  { %v1468_v13 = vadd.f32 %v2446_v10, %v2833_v60 }
 0xc56   :  { %v1462_v0 = vpop.f32.mrf.mxu0 }
 0xc57   :  { %v1463_v26 = vadd.f32 %v1462_v0, %v2838_v62  ;;  %v1474_v27 = vsel %vm548_vm2, %v1468_v13, -inf }
 0xc58   :  { %1475 = vmax.xlane.f32.xlu0 %v1474_v27 }
 0xc59   :  { %v1471_v28 = vsel %vm548_vm2, %v1463_v26, -inf }
 0xc5a   :  { %1472 = vmax.xlane.f32.xlu1 %v1471_v28 }
 0xc6b   :  { %1251 = vrot.lane.b32.xlu1 %v2395_v51, %s2589_s18 }
 0xc6e   :  { %1249 = vrot.lane.b32.xlu0 %v1119_v53, %s2589_s18 }
 0xce1   :  { %v1476_v36 = vpop.xlane.xlu0 %1475 }
 0xce2   :  { %v1478_v39 = vsub.f32 %v1468_v13, %v1476_v36 }
 0xce3   :  { %v1473_v37 = vpop.xlane.xlu1 %1472 }
 0xce4   :  { %v1477_v38 = vsub.f32 %v1463_v26, %v1473_v37  ;;  %v1481_v62 = vmul.f32 1.442695, %v1478_v39 }
 0xce5   :  { %v1250_v60 = vpop.permute.xlu0 %1249 }
 0xce6   :  { %v1479_v40 = vmul.f32 1.442695, %v1477_v38  ;;  %v2070_v38 = vld [vmem:[%s3215_s8 + $0x1] ss:$0 sm:$0xff] }
 0xce7   :  { %v1252_v41 = vpop.permute.xlu1 %1251 }
 0xce8   :  { %2412 = vmatprep.subr.mxu1 %v1252_v41  ;;  %2551 = vpow2.f32 %v1479_v40 }
 0xce9   :  { %2413 = vmatpush3.msra.mxu1 %v1252_v41  ;;  %2553 = vpow2.f32 %v1481_v62  ;;  %v2078_v62 = vld [vmem:[%s3217_s10 + $0x48] sm:$0xff] }
 0xcea   :  { %2414 = vmatprep.subr.mxu1 %v1250_v60 }
 0xceb   :  { %2415 = vmatpush3.msra.mxu1 %v1250_v60  ;;  %v2079_v60 = vld [vmem:[%s3217_s10 + $0x50] sm:$0xff] }
 0xcec   :  { %2417 = vmatmul.mubr.msk.f32.vlgmr.msra.gmra.mxu1 %vm188_vm1, %v2716_v29  ;;  %2447 = vmatprep.subr.mxu1 %v2849_v12 }
 0xced   :  { %2448 = vmatpush3.msra.mxu1 %v2849_v12  ;;  %2419 = vmatprep.mubr.msk.f32.mxu1 %vm188_vm1, %v2721_v30 }
 0xcee   :  { %2449 = vmatprep.subr.mxu1 %v2854_v14 }
 0xcef   :  { %2450 = vmatpush3.msra.mxu1 %v2854_v14 }
 0xcf0   :  { %2420 = vmatmul.mubr.msk.f32.gmra.mxu1 %vm188_vm1, %v2730_v31  ;;  %2451 = vmatprep.subr.mxu1 %v2865_v15  ;;  %v2067_v31 = vld [vmem:[%s3214_s7 + $0x38] sm:$0xff] }
 0xcf1   :  { %2452 = vmatpush3.msra.mxu1 %v2865_v15  ;;  %2422 = vmatprep.mubr.msk.f32.mxu1 %vm188_vm1, %v2735_v32  ;;  %v2066_v32 = vld [vmem:[%s3214_s7 + $0x30] sm:$0xff] }
 0xcf2   :  { %2453 = vmatprep.subr.mxu1 %v2872_v16  ;;  %2485 = vmatprep.subr.mxu0 %v2067_v31 }
 0xcf3   :  { %2454 = vmatpush3.msra.mxu1 %v2872_v16  ;;  %2486 = vmatpush3.msra.mxu0 %v2067_v31 }
 0xcf4   :  { %2423 = vmatmul.mubr.msk.f32.gmra.mxu1 %vm188_vm1, %v2744_v33  ;;  %2455 = vmatprep.subr.mxu1 %v2883_v17 }
 0xcf5   :  { %2456 = vmatpush3.msra.mxu1 %v2883_v17  ;;  %2425 = vmatprep.mubr.msk.f32.mxu1 %vm188_vm1, %v2749_v34  ;;  %v2552_v29 = vpop.eup %2551 }
 0xcf6   :  { %2457 = vmatprep.subr.mxu1 %v2890_v18  ;;  %v2554_v30 = vpop.eup %2553  ;;  %2487 = vmatprep.subr.mxu0 %v2066_v32 }
 0xcf7   :  { %2458 = vmatpush3.msra.mxu1 %v2890_v18  ;;  %2488 = vmatpush3.msra.mxu0 %v2066_v32 }
 0xcf8   :  { %2426 = vmatmul.mubr.msk.f32.gmra.mxu1 %vm188_vm1, %v2758_v35  ;;  %2459 = vmatprep.subr.mxu1 %v2901_v19 }
 0xcf9   :  { %2460 = vmatpush3.msra.mxu1 %v2901_v19  ;;  %2463 = vmatprep.mubr.msk.f32.mxu1 %vm548_vm2, %v2552_v29 }
 0xcfa   :  { %2461 = vmatprep.subr.mxu1 %v2908_v21 }
 0xcfb   :  { %2462 = vmatpush3.msra.mxu1 %v2908_v21 }
 0xcfc   :  { %2464 = vmatmul.mubr.msk.f32.vlgmr.msra.gmra.mxu1 %vm548_vm2, %v2554_v30 }
 0xdac   :  { %v2418_v33 = vpop.f32.mrf.mxu1 }
 0xdae   :  { %v1321_v34 = vpop.f32.mrf.mxu1 }
 0xdb0   :  { %v2421_v35 = vpop.f32.mrf.mxu1 }
 0xdb2   :  { %v1331_v12 = vpop.f32.mrf.mxu1 }
 0xdb4   :  { %v2424_v14 = vpop.f32.mrf.mxu1 }
 0xdb5   :  { %v1365_v43 = vmul.f32 %v2424_v14, %v2780_v48  ;;  %v1361_v48 = vmul.f32 %v2418_v33, %v2812_v56  ;;  %v2064_v56 = vld [vmem:[%s3214_s7 + $0x20] sm:$0xff] }
 0xdb6   :  { %v1341_v15 = vpop.f32.mrf.mxu1 }
 0xdb7   :  { %v1364_v47 = vmul.f32 %v1341_v15, %v2788_v50  ;;  %v1360_v50 = vmul.f32 %v1321_v34, %v2820_v58 }
 0xdb8   :  { %v2427_v16 = vpop.f32.mrf.mxu1 }
 0xdb9   :  { %v1367_v17 = vmul.f32 %v2427_v16, %v2767_v42  ;;  %v1363_v42 = vmul.f32 %v2421_v35, %v2796_v52 }
 0xdba   :  { %v1351_v18 = vpop.f32.mrf.mxu1 }
 0xdbb   :  { %v1366_v19 = vmul.f32 %v1351_v18, %v2772_v44  ;;  %2466 = vmatprep.subr.mxu1 %v1367_v17  ;;  %v1362_v44 = vmul.f32 %v1331_v12, %v2804_v54  ;;  %v2065_v54 = vld [vmem:[%s3214_s7 + $0x28] sm:$0xff]  ;;  %s1976_s7 = sshll.u32 %s2591_s1, 4  ;;  %s1977_s7 = int_to_ptr.vmem [resolvable:$true] %s1976_s7 }
 0xdbc   :  { %v2465_v21 = vpop.f32.mrf.mxu1  ;;  %2467 = vmatpush3.msra.mxu1 %v1367_v17  ;;  %2489 = vmatprep.subr.mxu0 %v2065_v54  ;;  %s2567_s16 = scalar_lea.vmem %s1977_s7, 256  ;;  %p2572_p1 = scmp.lt.s32.totalorder %s1977_s7, %s1977_s7 }
 0xdbd   :  { %vm1565_vm5 = vcmp.gt.f32.partialorder %v2465_v21, 0.0  ;;  %2468 = vmatprep.subr.mxu1 %v1366_v19  ;;  %2490 = vmatpush3.msra.mxu0 %v2065_v54  ;;  %p2568_p0 = scmp.ne.s32.totalorder %s1977_s7, %s2567_s16  ;;  %p2573_p2 = scmp.lt.s32.totalorder %s2567_s16, %s2567_s16 }
 0xdbe   :  { %v1567_v45 = vsel %vm1565_vm5, %v2465_v21, 1.0  ;;  %v1555_v46 = vpop.f32.mrf.mxu1  ;;  %2469 = vmatpush3.msra.mxu1 %v1366_v19  ;;  %2491 = vmatprep.subr.mxu0 %v2064_v56 }
 0xdbf   :  { %vm1564_vm6 = vcmp.gt.f32.partialorder %v1555_v46, 0.0  ;;  %2470 = vmatprep.subr.mxu1 %v1365_v43  ;;  %2555 = vrcp.f32 %v1567_v45  ;;  %2492 = vmatpush3.msra.mxu0 %v2064_v56  ;;  %p2574_p3 = por %p2573_p2, %p2572_p1 }
 0xdc0   :  { %v1566_v49 = vsel %vm1564_vm6, %v1555_v46, 1.0  ;;  %2471 = vmatpush3.msra.mxu1 %v1365_v43  ;;  %2507 = vmatprep.subr.mxu0 %v2084_v8 }
 0xdc1   :  { %2557 = vrcp.f32 %v1566_v49  ;;  %2472 = vmatprep.subr.mxu1 %v1364_v47  ;;  %p2575_p4 = pnand %p2574_p3, %p2568_p0 }
 0xdc2   :  { %2473 = vmatpush3.msra.mxu1 %v1364_v47 }
 0xdc3   :  { %2474 = vmatprep.subr.mxu1 %v1363_v42 }
 0xdc4   :  { %2475 = vmatpush3.msra.mxu1 %v1363_v42  ;;  %v2087_v42 = vld [vmem:[%s3218_s11] ss:$0 sm:$0xff] }
 0xdc5   :  { %2476 = vmatprep.subr.mxu1 %v1362_v44 }
 0xdc6   :  { %2477 = vmatpush3.msra.mxu1 %v1362_v44 }
 0xdc7   :  { %2478 = vmatprep.subr.mxu1 %v1361_v48 }
 0xdc8   :  { %2479 = vmatpush3.msra.mxu1 %v1361_v48 }
 0xdc9   :  { %2480 = vmatprep.subr.mxu1 %v1360_v50 }
 0xdca   :  { %2481 = vmatpush3.msra.mxu1 %v1360_v50 }
 0xdcc   :  { %v2556_v51 = vpop.eup %2555 }
 0xdcd   :  { %v1571_v55 = vmul.f32 %v2556_v51, %v2554_v30 }
 0xdce   :  { %v2558_v53 = vpop.eup %2557 }
 0xdcf   :  { %v1569_v52 = vmul.f32 %v2558_v53, %v2552_v29  ;;  %v2077_v29 = vld [vmem:[%s3217_s10 + $0x40] sm:$0xff] }
 0xdd1   :  { %2482 = vmatprep.mubr.msk.f32.mxu1 %vm548_vm2, %v1569_v52 }
 0xdd2   :  { %2483 = vmatmul.mubr.msk.f32.vlgmr.msra.gmra.mxu1 %vm548_vm2, %v1571_v55 }
 0xe92   :  { %v2484_v58 = vpop.f32.mrf.mxu1 }
 0xe94   :  { %v1644_v57 = vpop.f32.mrf.mxu1 }
 0xe95   :  { %2493 = vmatprep.mubr.msk.f32.mxu0 %vm73_vm0, %v1644_v57 }
 0xe96   :  { %2494 = vmatmul.mubr.msk.f32.vlgmr.msra.gmra.mxu0 %vm73_vm0, %v2484_v58 }
 0xe97   :  { %2508 = vmatpush3.msra.mxu0 %v2084_v8 }
 0xe98   :  { %2509 = vmatprep.subr.mxu0 %v2083_v9 }
 0xe99   :  { %2510 = vmatpush3.msra.mxu0 %v2083_v9 }
 0xe9a   :  { %2511 = vmatprep.subr.mxu0 %v2082_v22 }
 0xe9b   :  { %2512 = vmatpush3.msra.mxu0 %v2082_v22 }
 0xe9c   :  { %2513 = vmatprep.subr.mxu0 %v2081_v24 }
 0xe9d   :  { %2514 = vmatpush3.msra.mxu0 %v2081_v24 }
 0xe9e   :  { %2515 = vmatprep.subr.mxu0 %v2080_v25 }
 0xe9f   :  { %2516 = vmatpush3.msra.mxu0 %v2080_v25 }
 0xea0   :  { %2517 = vmatprep.subr.mxu0 %v2079_v60 }
 0xea1   :  { %2518 = vmatpush3.msra.mxu0 %v2079_v60 }
 0xea2   :  { %2519 = vmatprep.subr.mxu0 %v2078_v62 }
 0xea3   :  { %2520 = vmatpush3.msra.mxu0 %v2078_v62 }
 0xea4   :  { %2521 = vmatprep.subr.mxu0 %v2077_v29 }
 0xea5   :  { %2522 = vmatpush3.msra.mxu0 %v2077_v29 }
 0xf56   :  { %v2495_v23 = vpop.f32.mrf.mxu0 }
 0xf57   :  { %v3139_v59 = vadd.f32 %v2495_v23, %v3002_v11  ;;  %v2074_v11 = vld [vmem:[%s3216_s9 + $0x38] sm:$0xff] }
 0xf58   :  { %v1730_v61 = vpop.f32.mrf.mxu0  ;;  %2496 = vmatprep.subr.mxu1 %v2074_v11 }
 0xf59   :  { %v3142_v63 = vadd.f32 %v1730_v61, %v3005_v20  ;;  %v1743_v2 = vmul.f32 %v3139_v59, %v3139_v59  ;;  %v2073_v20 = vld [vmem:[%s3216_s9 + $0x30] sm:$0xff]  ;;  %2497 = vmatpush3.msra.mxu1 %v2074_v11 }
 0xf5a   :  { %2498 = vmatprep.subr.mxu1 %v2073_v20 }
 0xf5b   :  { %v1747_v3 = vsel %vm73_vm0, %v1743_v2, 0.0  ;;  %v1742_v4 = vmul.f32 %v3142_v63, %v3142_v63  ;;  %2499 = vmatpush3.msra.mxu1 %v2073_v20 }
 0xf5c   :  { %1748 = vadd.xlane.f32.xlu0 %v1747_v3  ;;  %2500 = vmatprep.subr.mxu1 %v2072_v6 }
 0xf5d   :  { %v1744_v5 = vsel %vm73_vm0, %v1742_v4, 0.0  ;;  %2501 = vmatpush3.msra.mxu1 %v2072_v6 }
 0xf5e   :  { %1745 = vadd.xlane.f32.xlu1 %v1744_v5  ;;  %2502 = vmatprep.subr.mxu1 %v2071_v7 }
 0xf5f   :  { %2503 = vmatpush3.msra.mxu1 %v2071_v7 }
 0xfe5   :  { %v1749_v1 = vpop.xlane.xlu0 %1748 }
 0xfe6   :  { %v1751_v10 = vmul.f32 0.03125, %v1749_v1 }
 0xfe7   :  { %v1746_v13 = vpop.xlane.xlu1 %1745 }
 0xfe8   :  { %v1753_v0 = vadd.f32 1e-06, %v1751_v10  ;;  %v1750_v26 = vmul.f32 0.03125, %v1746_v13 }
 0xfea   :  { %2559 = vrsqrt.f32 %v1753_v0  ;;  %v1752_v27 = vadd.f32 1e-06, %v1750_v26 }
 0xfec   :  { %2561 = vrsqrt.f32 %v1752_v27 }
 0xff7   :  { %v2560_v28 = vpop.eup %2559 }
 0xff8   :  { %v1757_v37 = vmul.f32 %v2560_v28, %v3139_v59 }
 0xff9   :  { %v2562_v36 = vpop.eup %2561 }
 0xffa   :  { %v1756_v39 = vmul.f32 %v2562_v36, %v3142_v63  ;;  %v1763_v41 = vmul.f32 %v2070_v38, %v1757_v37 }
 0xffc   :  { %v1762_v40 = vmul.f32 %v2070_v38, %v1756_v39 }
 0xffe   :  { %2504 = vmatprep.mubr.msk.f32.mxu1 %vm73_vm0, %v1762_v40 }
 0xfff   :  { %2505 = vmatmul.mubr.msk.f32.vlgmr.msra.gmra.mxu1 %vm73_vm0, %v1763_v41 }
0x10bf   :  { %v2506_v30 = vpop.f32.mrf.mxu1 }
0x10c0   :  { %v1851_v33 = vmax.f32 %v2506_v30, 0.0 }
0x10c1   :  { %v1841_v31 = vpop.f32.mrf.mxu1 }
0x10c2   :  { %v1850_v32 = vmax.f32 %v1841_v31, 0.0 }
0x10c4   :  { %2523 = vmatprep.mubr.msk.f32.mxu0 %vm548_vm2, %v1850_v32 }
0x10c5   :  { %2524 = vmatmul.mubr.msk.f32.vlgmr.msra.gmra.mxu0 %vm548_vm2, %v1851_v33 }
0x1185   :  { %v2525_v34 = vpop.f32.mrf.mxu0 }
0x1186   :  { %v1943_v12 = vadd.f32 %v2525_v34, %v3139_v59 }
0x1187   :  { %v1933_v35 = vpop.f32.mrf.mxu0 }
0x1188   :  { %v1942_v14 = vadd.f32 %v1933_v35, %v3142_v63  ;;  %v1946_v17 = vmul.f32 %v1943_v12, %v1943_v12 }
0x118a   :  { %v1945_v15 = vmul.f32 %v1942_v14, %v1942_v14  ;;  %v1950_v18 = vsel %vm73_vm0, %v1946_v17, 0.0 }
0x118c   :  { %v1947_v16 = vsel %vm73_vm0, %v1945_v15, 0.0 }
0x118d   :  { %1948 = vadd.xlane.f32.xlu1 %v1947_v16 }
0x1191   :  { %1951 = vadd.xlane.f32.xlu1 %v1950_v18 }
0x1216   :  { %v1949_v19 = vpop.xlane.xlu1 %1948 }
0x1217   :  { %v1953_v21 = vmul.f32 0.03125, %v1949_v19 }
0x1219   :  { %v1955_v43 = vadd.f32 1e-06, %v1953_v21 }
0x121a   :  { %v1952_v45 = vpop.xlane.xlu1 %1951 }
0x121b   :  { %2563 = vrsqrt.f32 %v1955_v43  ;;  %v1954_v46 = vmul.f32 0.03125, %v1952_v45 }
0x121d   :  { %v1956_v47 = vadd.f32 1e-06, %v1954_v46 }
0x121f   :  { %2565 = vrsqrt.f32 %v1956_v47 }
0x1228   :  { %v2564_v49 = vpop.eup %2563 }
0x1229   :  { %v1959_v44 = vmul.f32 %v2564_v49, %v1942_v14 }
0x122b   :  { %v1967_v48 = vmul.f32 %v2087_v42, %v1959_v44 }
0x122c   :  { %v2566_v50 = vpop.eup %2565 }
0x122d   :  { %v1960_v51 = vmul.f32 %v2566_v50, %v1943_v12  ;;  %1969 = vst.msk [vmem:[#allocation2] sm:$0xff] %vm73_vm0, %v1967_v48 }
0x122f   :  { %v1968_v53 = vmul.f32 %v2087_v42, %v1960_v51 }
0x1231   :  { %1970 = vst.msk [vmem:[#allocation2 + $0x8] sm:$0xff] %vm73_vm0, %v1968_v53 }
0x1232   :  { %2578 = shalt.err (!%p2575_p4)
}
0x1233   :  { %s2592_s11 = smov 128   ;;  %s2593_s2 = smov 8  }
0x1234   :  { %1982 = dma.vmem_to_hbm [thread:$0]  %s1977_s7, 256, %s3219_s12, [#allocation3], %s2592_s11, %s2592_s11, %s2593_s2  }
0x1235   :  { %2587 = dma.done.wait [#allocation3], 256  }
0x1236   :  { %2588 = vsyncadd [#allocation3], 4294967040 }
0x1237   :  { %1986 = vsyncpa [#allocation3], 1 }

</bundles_post_ra>
